<compile_context>
chip_gen: v7x
topology: tpu7x:2x2x1
jax: 0.10.0
libtpu: 0.0.40
codegen_flags: <defaults>
</compile_context>

<pallas_src>
import functools

import numpy as np
import jax
import jax.numpy as jnp
from jax.experimental import pallas as pl
from jax.experimental.pallas import tpu as pltpu

# ----------------------------------------------------------------------------
# Small config consistent with Actor.__init__
# ----------------------------------------------------------------------------
OBS_SHAPE = (4, 16, 16)   # (C, H, W), NCHW input (PyTorch convention)
ACTION_DIM = 4
HIDDEN_DIM = 32
FEATURE_DIM = 32          # encoder_feature_dim
NUM_FILTERS = 8
LOG_STD_MIN = -10.0
LOG_STD_MAX = 2.0
LN_EPS = 1e-5
OUT_WIDTH = 128           # lane-dense packed output slab width

_C, _H, _W = OBS_SHAPE
_H1 = (_H - 3) // 2 + 1            # after conv1 (k=3, stride=2)
_W1 = (_W - 3) // 2 + 1
_H2 = _H1 - 2                      # after conv2 (k=3, stride=1)
_W2 = _W1 - 2
IN_FLAT = _C * _H * _W             # 1024
CONV1_FLAT = NUM_FILTERS * _H1 * _W1   # 392
CONV_FLAT = NUM_FILTERS * _H2 * _W2    # 200


# ----------------------------------------------------------------------------
# Fused kernel: conv1 + conv2 + fc + LayerNorm + trunk + heads + sample/squash
# ----------------------------------------------------------------------------
def _actor_fused_kernel(x_ref, noise_ref,
                        m1_ref, b1_ref, m2_ref, b2_ref,
                        wfc_ref, bfc_ref, g_ref, beta_ref,
                        w1_ref, tb1_ref, w2_ref, tb2_ref, w3_ref, tb3_ref,
                        out_ref, *, action_dim, log_std_min, log_std_max):
    x = x_ref[...]                       # (tb, C*H*W), NCHW row-major flatten

    # Encoder convs as exact dense linear maps on the NCHW-flat activation.
    # (weights pre-expanded at init; obs/255 scale folded into m1; bias after)
    a1 = jnp.maximum(
        jnp.dot(x, m1_ref[...], preferred_element_type=jnp.float32)
        + b1_ref[...], 0.0)
    a2 = jnp.maximum(
        jnp.dot(a1, m2_ref[...], preferred_element_type=jnp.float32)
        + b2_ref[...], 0.0)

    # Encoder fc + LayerNorm (output_logits=True -> no tanh on the features).
    h = jnp.dot(a2, wfc_ref[...], preferred_element_type=jnp.float32) + bfc_ref[...]
    mean = jnp.mean(h, axis=-1, keepdims=True)
    var = jnp.mean((h - mean) ** 2, axis=-1, keepdims=True)
    h = (h - mean) * jax.lax.rsqrt(var + LN_EPS) * g_ref[...] + beta_ref[...]

    # Trunk MLP: Linear -> ReLU -> Linear -> ReLU -> Linear
    t = jnp.maximum(jnp.dot(h, w1_ref[...],
                            preferred_element_type=jnp.float32) + tb1_ref[...], 0.0)
    t = jnp.maximum(jnp.dot(t, w2_ref[...],
                            preferred_element_type=jnp.float32) + tb2_ref[...], 0.0)
    out = jnp.dot(t, w3_ref[...],
                  preferred_element_type=jnp.float32) + tb3_ref[...]

    # chunk(2, dim=-1)
    mu = out[:, :action_dim]
    log_std = out[:, action_dim:]

    # tanh + rescale of log_std
    log_std = jnp.tanh(log_std)
    log_std = log_std_min + 0.5 * (log_std_max - log_std_min) * (log_std + 1.0)

    # reparameterized sample (noise replaces torch.randn_like(mu))
    std = jnp.exp(log_std)
    noise = noise_ref[...]
    pi = mu + noise * std

    # gaussian_logprob
    log_pi = jnp.sum(-0.5 * noise * noise - log_std, axis=-1, keepdims=True) \
        - 0.5 * np.log(2.0 * np.pi) * action_dim

    # squash
    mu_t = jnp.tanh(mu)
    pi_t = jnp.tanh(pi)
    log_pi = log_pi - jnp.sum(
        jnp.log(jnp.maximum(1.0 - pi_t * pi_t, 0.0) + 1e-6),
        axis=-1, keepdims=True)

    # Single lane-dense output slab (one output DMA):
    #   lanes [0:4)=mu, [4:8)=pi, [8:12)=log_std, [12:16)=log_pi (broadcast), rest 0.
    out_ref[...] = jnp.zeros_like(out_ref)
    out_ref[:, 0:action_dim] = mu_t
    out_ref[:, action_dim:2 * action_dim] = pi_t
    out_ref[:, 2 * action_dim:3 * action_dim] = log_std
    out_ref[:, 3 * action_dim:4 * action_dim] = jnp.broadcast_to(
        log_pi, (log_pi.shape[0], action_dim))


# ----------------------------------------------------------------------------
# Wrapper
# ----------------------------------------------------------------------------
def _batch_tile(b):
    # Shard large batches across TensorCores via the 1-D "parallel" grid;
    # a single whole-batch block is always legal (block dim == array dim).
    if b > 128 and b % 128 == 0:
        return 128
    return b


@jax.jit
def actor_forward(obs, noise, params):
    """Equivalent of Actor.forward(obs, compute_pi=True, compute_log_pi=True).

    Returns (mu, pi, log_pi, log_std)."""
    b = obs.shape[0]
    x = obs.reshape(b, -1)          # NCHW row-major flatten: free, no transpose

    tb = _batch_tile(b)
    grid = (b // tb,)

    def row_spec(cols):
        return pl.BlockSpec((tb, cols), lambda i: (i, 0))

    def full_spec(shape):
        return pl.BlockSpec(shape, lambda i: (0, 0))

    slab = pl.pallas_call(
        functools.partial(_actor_fused_kernel,
                          action_dim=ACTION_DIM,
                          log_std_min=LOG_STD_MIN,
                          log_std_max=LOG_STD_MAX),
        out_shape=jax.ShapeDtypeStruct((b, OUT_WIDTH), jnp.float32),
        grid=grid,
        in_specs=[
            row_spec(IN_FLAT),                        # x
            row_spec(ACTION_DIM),                     # noise
            full_spec((IN_FLAT, CONV1_FLAT)),         # m1 (dense conv1)
            full_spec((1, CONV1_FLAT)),               # b1
            full_spec((CONV1_FLAT, CONV_FLAT)),       # m2 (dense conv2)
            full_spec((1, CONV_FLAT)),                # b2
            full_spec((CONV_FLAT, FEATURE_DIM)),      # w_fc
            full_spec((1, FEATURE_DIM)),              # b_fc
            full_spec((1, FEATURE_DIM)),              # ln_g
            full_spec((1, FEATURE_DIM)),              # ln_b
            full_spec((FEATURE_DIM, HIDDEN_DIM)),     # t_w1
            full_spec((1, HIDDEN_DIM)),               # t_b1
            full_spec((HIDDEN_DIM, HIDDEN_DIM)),      # t_w2
            full_spec((1, HIDDEN_DIM)),               # t_b2
            full_spec((HIDDEN_DIM, 2 * ACTION_DIM)),  # t_w3
            full_spec((1, 2 * ACTION_DIM)),           # t_b3
        ],
        out_specs=row_spec(OUT_WIDTH),
        compiler_params=pltpu.CompilerParams(
            dimension_semantics=("parallel",)),
    )(x, noise,
      params["m1"], params["b1"], params["m2"], params["b2"],
      params["w_fc"], params["b_fc"], params["ln_g"], params["ln_b"],
      params["t_w1"], params["t_b1"], params["t_w2"], params["t_b2"],
      params["t_w3"], params["t_b3"])

    mu = slab[:, 0:ACTION_DIM]
    pi = slab[:, ACTION_DIM:2 * ACTION_DIM]
    log_std = slab[:, 2 * ACTION_DIM:3 * ACTION_DIM]
    log_pi = slab[:, 3 * ACTION_DIM:3 * ACTION_DIM + 1]
    return mu, pi, log_pi, log_std


# ----------------------------------------------------------------------------
# Parameter construction (matches PyTorch weight_init) + conv -> dense expansion
# ----------------------------------------------------------------------------
def _orthogonal(rng, rows, cols, gain=1.0):
    n = max(rows, cols)
    a = rng.standard_normal((n, n))
    q, r = np.linalg.qr(a)
    q = q * np.sign(np.diag(r))[None, :]
    return (gain * q[:rows, :cols]).astype(np.float32)


def _conv_as_dense(w, bias, h_in, w_in, stride):
    """Expand a (F, C, K, K) VALID conv into its exact dense linear map acting
    on the NCHW-flattened activation.  Column order of the output is the NCHW
    flatten (f, y, x), i.e. exactly PyTorch's conv output .view(B, -1)."""
    f, c, k, _ = w.shape
    h_out = (h_in - k) // stride + 1
    w_out = (w_in - k) // stride + 1
    m = np.zeros((c * h_in * w_in, f * h_out * w_out), np.float32)
    for ff in range(f):
        for yy in range(h_out):
            for xx in range(w_out):
                col = ff * h_out * w_out + yy * w_out + xx
                for cc in range(c):
                    for ky in range(k):
                        for kx in range(k):
                            row = (cc * h_in * w_in
                                   + (yy * stride + ky) * w_in
                                   + (xx * stride + kx))
                            m[row, col] = w[ff, cc, ky, kx]
    b_wide = np.repeat(bias, h_out * w_out)[None, :].astype(np.float32)
    return m, b_wide


def init_params():
    rng = np.random.default_rng(0)
    relu_gain = float(np.sqrt(2.0))

    # conv weights per weight_init: zero-filled, centre tap orthogonal * gain
    w_c1 = np.zeros((NUM_FILTERS, _C, 3, 3), np.float32)
    w_c1[:, :, 1, 1] = _orthogonal(rng, NUM_FILTERS, _C, relu_gain)
    b_c1 = np.zeros((NUM_FILTERS,), np.float32)
    w_c2 = np.zeros((NUM_FILTERS, NUM_FILTERS, 3, 3), np.float32)
    w_c2[:, :, 1, 1] = _orthogonal(rng, NUM_FILTERS, NUM_FILTERS, relu_gain)
    b_c2 = np.zeros((NUM_FILTERS,), np.float32)

    m1, b1w = _conv_as_dense(w_c1, b_c1, _H, _W, 2)
    m1 *= 1.0 / 255.0                 # fold the obs/255. pixel scale into conv1
    m2, b2w = _conv_as_dense(w_c2, b_c2, _H1, _W1, 1)

    params = {
        "m1": jnp.asarray(m1), "b1": jnp.asarray(b1w),
        "m2": jnp.asarray(m2), "b2": jnp.asarray(b2w),
        # encoder fc + LayerNorm (Linear weights stored as (in, out))
        "w_fc": jnp.asarray(_orthogonal(rng, FEATURE_DIM, CONV_FLAT).T),
        "b_fc": jnp.zeros((1, FEATURE_DIM), jnp.float32),
        "ln_g": jnp.ones((1, FEATURE_DIM), jnp.float32),
        "ln_b": jnp.zeros((1, FEATURE_DIM), jnp.float32),
        # trunk
        "t_w1": jnp.asarray(_orthogonal(rng, HIDDEN_DIM, FEATURE_DIM).T),
        "t_b1": jnp.zeros((1, HIDDEN_DIM), jnp.float32),
        "t_w2": jnp.asarray(_orthogonal(rng, HIDDEN_DIM, HIDDEN_DIM).T),
        "t_b2": jnp.zeros((1, HIDDEN_DIM), jnp.float32),
        "t_w3": jnp.asarray(_orthogonal(rng, 2 * ACTION_DIM, HIDDEN_DIM).T),
        "t_b3": jnp.zeros((1, 2 * ACTION_DIM), jnp.float32),
    }
    # original-form conv weights, kept only for the pure-JAX reference check
    ref = {"w_c1": jnp.asarray(w_c1), "b_c1": jnp.asarray(b_c1),
           "w_c2": jnp.asarray(w_c2), "b_c2": jnp.asarray(b_c2)}
    return params, ref


# ----------------------------------------------------------------------------
# Pure-JAX reference (real convs, unfused) used only as a correctness check
# ----------------------------------------------------------------------------
def actor_forward_ref(obs, noise, params, ref):
    dn = ("NCHW", "OIHW", "NCHW")
    x = obs / 255.0
    x = jax.lax.conv_general_dilated(x, ref["w_c1"], (2, 2), "VALID",
                                     dimension_numbers=dn)
    x = jnp.maximum(x + ref["b_c1"][None, :, None, None], 0.0)
    x = jax.lax.conv_general_dilated(x, ref["w_c2"], (1, 1), "VALID",
                                     dimension_numbers=dn)
    x = jnp.maximum(x + ref["b_c2"][None, :, None, None], 0.0)
    h = x.reshape(x.shape[0], -1) @ params["w_fc"] + params["b_fc"]
    mean = h.mean(-1, keepdims=True)
    var = ((h - mean) ** 2).mean(-1, keepdims=True)
    h = (h - mean) / jnp.sqrt(var + LN_EPS) * params["ln_g"] + params["ln_b"]
    t = jnp.maximum(h @ params["t_w1"] + params["t_b1"], 0.0)
    t = jnp.maximum(t @ params["t_w2"] + params["t_b2"], 0.0)
    out = t @ params["t_w3"] + params["t_b3"]
    mu, log_std = out[:, :ACTION_DIM], out[:, ACTION_DIM:]
    log_std = jnp.tanh(log_std)
    log_std = LOG_STD_MIN + 0.5 * (LOG_STD_MAX - LOG_STD_MIN) * (log_std + 1.0)
    std = jnp.exp(log_std)
    pi = mu + noise * std
    log_pi = jnp.sum(-0.5 * noise ** 2 - log_std, -1, keepdims=True) \
        - 0.5 * np.log(2.0 * np.pi) * ACTION_DIM
    mu_t, pi_t = jnp.tanh(mu), jnp.tanh(pi)
    log_pi = log_pi - jnp.sum(jnp.log(jnp.maximum(1.0 - pi_t ** 2, 0.0) + 1e-6),
                              -1, keepdims=True)
    return mu_t, pi_t, log_pi, log_std


if __name__ == "__main__":
    key = jax.random.PRNGKey(0)
    k_obs, k_noise = jax.random.split(key)

    B = 2   # throughput note: per-call cost is ~flat until B reaches MXU width;
            # batch more environments per forward for real throughput.
    obs = jax.random.uniform(k_obs, (B,) + OBS_SHAPE,
                             dtype=jnp.float32, minval=0.0, maxval=255.0)
    # torch.randn_like(mu) replaced by explicit Gaussian noise input
    noise = jax.random.normal(k_noise, (B, ACTION_DIM), dtype=jnp.float32)

    params, ref_params = init_params()
    mu, pi, log_pi, log_std = actor_forward(obs, noise, params)
    jax.block_until_ready((mu, pi, log_pi, log_std))

    assert mu.shape == (B, ACTION_DIM)
    assert pi.shape == (B, ACTION_DIM)
    assert log_pi.shape == (B, 1)
    assert log_std.shape == (B, ACTION_DIM)

    # Check against the unfused pure-JAX reference (real convs).  Tolerance is
    # loose only because XLA and Mosaic may decompose f32 matmuls on the MXU
    # with different pass counts; layout/permutation bugs would be O(1) off.
    r_mu, r_pi, r_lp, r_ls = actor_forward_ref(obs, noise, params, ref_params)
    for got, want in ((mu, r_mu), (pi, r_pi), (log_pi, r_lp), (log_std, r_ls)):
        np.testing.assert_allclose(np.asarray(got), np.asarray(want),
                                   rtol=5e-2, atol=5e-2)

    print("KERNEL_OK")
</pallas_src>

<mosaic_0001>
module attributes {stable_mosaic.version = 11 : i64} {
  func.func @_actor_fused_kernel(%arg0: i32, %arg1: memref<2x1024xf32, #tpu.memory_space<vmem>>, %arg2: memref<2x4xf32, #tpu.memory_space<vmem>>, %arg3: memref<1024x392xf32, #tpu.memory_space<vmem>>, %arg4: memref<1x392xf32, #tpu.memory_space<vmem>>, %arg5: memref<392x200xf32, #tpu.memory_space<vmem>>, %arg6: memref<1x200xf32, #tpu.memory_space<vmem>>, %arg7: memref<200x32xf32, #tpu.memory_space<vmem>>, %arg8: memref<1x32xf32, #tpu.memory_space<vmem>>, %arg9: memref<1x32xf32, #tpu.memory_space<vmem>>, %arg10: memref<1x32xf32, #tpu.memory_space<vmem>>, %arg11: memref<32x32xf32, #tpu.memory_space<vmem>>, %arg12: memref<1x32xf32, #tpu.memory_space<vmem>>, %arg13: memref<32x32xf32, #tpu.memory_space<vmem>>, %arg14: memref<1x32xf32, #tpu.memory_space<vmem>>, %arg15: memref<32x8xf32, #tpu.memory_space<vmem>>, %arg16: memref<1x8xf32, #tpu.memory_space<vmem>>, %arg17: memref<2x128xf32, #tpu.memory_space<vmem>>) attributes {dimension_semantics = [#tpu.dimension_semantics<parallel>], iteration_bounds = array<i64: 1>, scalar_prefetch = 0 : i64, scratch_operands = 0 : i64, tpu.core_type = #tpu.core_type<tc>, window_params = [{transform_indices = @transform_0, window_bounds = array<i64: 2, 1024>}, {transform_indices = @transform_1, window_bounds = array<i64: 2, 4>}, {pipeline_mode = #tpu.pipeline_mode<synchronous>, transform_indices = @transform_2, window_bounds = array<i64: 1024, 392>}, {pipeline_mode = #tpu.pipeline_mode<synchronous>, transform_indices = @transform_3, window_bounds = array<i64: 1, 392>}, {pipeline_mode = #tpu.pipeline_mode<synchronous>, transform_indices = @transform_4, window_bounds = array<i64: 392, 200>}, {pipeline_mode = #tpu.pipeline_mode<synchronous>, transform_indices = @transform_5, window_bounds = array<i64: 1, 200>}, {pipeline_mode = #tpu.pipeline_mode<synchronous>, transform_indices = @transform_6, window_bounds = array<i64: 200, 32>}, {pipeline_mode = #tpu.pipeline_mode<synchronous>, transform_indices = @transform_7, window_bounds = array<i64: 1, 32>}, {pipeline_mode = #tpu.pipeline_mode<synchronous>, transform_indices = @transform_8, window_bounds = array<i64: 1, 32>}, {pipeline_mode = #tpu.pipeline_mode<synchronous>, transform_indices = @transform_9, window_bounds = array<i64: 1, 32>}, {pipeline_mode = #tpu.pipeline_mode<synchronous>, transform_indices = @transform_10, window_bounds = array<i64: 32, 32>}, {pipeline_mode = #tpu.pipeline_mode<synchronous>, transform_indices = @transform_11, window_bounds = array<i64: 1, 32>}, {pipeline_mode = #tpu.pipeline_mode<synchronous>, transform_indices = @transform_12, window_bounds = array<i64: 32, 32>}, {pipeline_mode = #tpu.pipeline_mode<synchronous>, transform_indices = @transform_13, window_bounds = array<i64: 1, 32>}, {pipeline_mode = #tpu.pipeline_mode<synchronous>, transform_indices = @transform_14, window_bounds = array<i64: 32, 8>}, {pipeline_mode = #tpu.pipeline_mode<synchronous>, transform_indices = @transform_15, window_bounds = array<i64: 1, 8>}, {transform_indices = @transform_16, window_bounds = array<i64: 2, 128>}]} {
    %c0 = arith.constant 0 : index
    %c0_0 = arith.constant 0 : index
    %0 = vector.load %arg1[%c0, %c0_0] : memref<2x1024xf32, #tpu.memory_space<vmem>>, vector<2x1024xf32>
    %c0_1 = arith.constant 0 : index
    %c0_2 = arith.constant 0 : index
    %1 = vector.load %arg3[%c0_1, %c0_2] : memref<1024x392xf32, #tpu.memory_space<vmem>>, vector<1024x392xf32>
    %cst = arith.constant dense<0.000000e+00> : vector<2x392xf32>
    %2 = tpu.matmul %0, %1, %cst {dimension_numbers = #tpu.dot_dimension_numbers<[1], [0], [0], [1], [0, 0, 1, 1], [], []>} : vector<2x1024xf32>, vector<1024x392xf32>, vector<2x392xf32> -> vector<2x392xf32>
    %c0_3 = arith.constant 0 : index
    %c0_4 = arith.constant 0 : index
    %3 = vector.load %arg4[%c0_3, %c0_4] : memref<1x392xf32, #tpu.memory_space<vmem>>, vector<1x392xf32>
    %4 = vector.broadcast %3 : vector<1x392xf32> to vector<2x392xf32>
    %5 = arith.addf %2, %4 : vector<2x392xf32>
    %cst_5 = arith.constant 0.000000e+00 : f32
    %6 = vector.broadcast %cst_5 : f32 to vector<2x392xf32>
    %7 = arith.maximumf %5, %6 : vector<2x392xf32>
    %c0_6 = arith.constant 0 : index
    %c0_7 = arith.constant 0 : index
    %8 = vector.load %arg5[%c0_6, %c0_7] : memref<392x200xf32, #tpu.memory_space<vmem>>, vector<392x200xf32>
    %cst_8 = arith.constant dense<0.000000e+00> : vector<2x200xf32>
    %9 = tpu.matmul %7, %8, %cst_8 {dimension_numbers = #tpu.dot_dimension_numbers<[1], [0], [0], [1], [0, 0, 1, 1], [], []>} : vector<2x392xf32>, vector<392x200xf32>, vector<2x200xf32> -> vector<2x200xf32>
    %c0_9 = arith.constant 0 : index
    %c0_10 = arith.constant 0 : index
    %10 = vector.load %arg6[%c0_9, %c0_10] : memref<1x200xf32, #tpu.memory_space<vmem>>, vector<1x200xf32>
    %11 = vector.broadcast %10 : vector<1x200xf32> to vector<2x200xf32>
    %12 = arith.addf %9, %11 : vector<2x200xf32>
    %cst_11 = arith.constant 0.000000e+00 : f32
    %13 = vector.broadcast %cst_11 : f32 to vector<2x200xf32>
    %14 = arith.maximumf %12, %13 : vector<2x200xf32>
    %c0_12 = arith.constant 0 : index
    %c0_13 = arith.constant 0 : index
    %15 = vector.load %arg7[%c0_12, %c0_13] : memref<200x32xf32, #tpu.memory_space<vmem>>, vector<200x32xf32>
    %cst_14 = arith.constant dense<0.000000e+00> : vector<2x32xf32>
    %16 = tpu.matmul %14, %15, %cst_14 {dimension_numbers = #tpu.dot_dimension_numbers<[1], [0], [0], [1], [0, 0, 1, 1], [], []>} : vector<2x200xf32>, vector<200x32xf32>, vector<2x32xf32> -> vector<2x32xf32>
    %c0_15 = arith.constant 0 : index
    %c0_16 = arith.constant 0 : index
    %17 = vector.load %arg8[%c0_15, %c0_16] : memref<1x32xf32, #tpu.memory_space<vmem>>, vector<1x32xf32>
    %18 = vector.broadcast %17 : vector<1x32xf32> to vector<2x32xf32>
    %19 = arith.addf %16, %18 : vector<2x32xf32>
    %cst_17 = arith.constant dense<0.000000e+00> : vector<2xf32>
    %20 = vector.multi_reduction <add>, %19, %cst_17 [1] : vector<2x32xf32> to vector<2xf32>
    %21 = vector.shape_cast %20 : vector<2xf32> to vector<2x1xf32>
    %cst_18 = arith.constant 3.200000e+01 : f32
    %22 = vector.broadcast %cst_18 : f32 to vector<2x1xf32>
    %23 = arith.divf %21, %22 : vector<2x1xf32>
    %24 = vector.broadcast %23 : vector<2x1xf32> to vector<2x32xf32>
    %25 = arith.subf %19, %24 : vector<2x32xf32>
    %26 = arith.mulf %25, %25 : vector<2x32xf32>
    %cst_19 = arith.constant dense<0.000000e+00> : vector<2xf32>
    %27 = vector.multi_reduction <add>, %26, %cst_19 [1] : vector<2x32xf32> to vector<2xf32>
    %28 = vector.shape_cast %27 : vector<2xf32> to vector<2x1xf32>
    %cst_20 = arith.constant 3.200000e+01 : f32
    %29 = vector.broadcast %cst_20 : f32 to vector<2x1xf32>
    %30 = arith.divf %28, %29 : vector<2x1xf32>
    %31 = vector.broadcast %23 : vector<2x1xf32> to vector<2x32xf32>
    %32 = arith.subf %19, %31 : vector<2x32xf32>
    %cst_21 = arith.constant 9.99999974E-6 : f32
    %33 = vector.broadcast %cst_21 : f32 to vector<2x1xf32>
    %34 = arith.addf %30, %33 : vector<2x1xf32>
    %35 = math.rsqrt %34 : vector<2x1xf32>
    %36 = vector.broadcast %35 : vector<2x1xf32> to vector<2x32xf32>
    %37 = arith.mulf %32, %36 : vector<2x32xf32>
    %c0_22 = arith.constant 0 : index
    %c0_23 = arith.constant 0 : index
    %38 = vector.load %arg9[%c0_22, %c0_23] : memref<1x32xf32, #tpu.memory_space<vmem>>, vector<1x32xf32>
    %39 = vector.broadcast %38 : vector<1x32xf32> to vector<2x32xf32>
    %40 = arith.mulf %37, %39 : vector<2x32xf32>
    %c0_24 = arith.constant 0 : index
    %c0_25 = arith.constant 0 : index
    %41 = vector.load %arg10[%c0_24, %c0_25] : memref<1x32xf32, #tpu.memory_space<vmem>>, vector<1x32xf32>
    %42 = vector.broadcast %41 : vector<1x32xf32> to vector<2x32xf32>
    %43 = arith.addf %40, %42 : vector<2x32xf32>
    %c0_26 = arith.constant 0 : index
    %c0_27 = arith.constant 0 : index
    %44 = vector.load %arg11[%c0_26, %c0_27] : memref<32x32xf32, #tpu.memory_space<vmem>>, vector<32x32xf32>
    %cst_28 = arith.constant dense<0.000000e+00> : vector<2x32xf32>
    %45 = tpu.matmul %43, %44, %cst_28 {dimension_numbers = #tpu.dot_dimension_numbers<[1], [0], [0], [1], [0, 0, 1, 1], [], []>} : vector<2x32xf32>, vector<32x32xf32>, vector<2x32xf32> -> vector<2x32xf32>
    %c0_29 = arith.constant 0 : index
    %c0_30 = arith.constant 0 : index
    %46 = vector.load %arg12[%c0_29, %c0_30] : memref<1x32xf32, #tpu.memory_space<vmem>>, vector<1x32xf32>
    %47 = vector.broadcast %46 : vector<1x32xf32> to vector<2x32xf32>
    %48 = arith.addf %45, %47 : vector<2x32xf32>
    %cst_31 = arith.constant 0.000000e+00 : f32
    %49 = vector.broadcast %cst_31 : f32 to vector<2x32xf32>
    %50 = arith.maximumf %48, %49 : vector<2x32xf32>
    %c0_32 = arith.constant 0 : index
    %c0_33 = arith.constant 0 : index
    %51 = vector.load %arg13[%c0_32, %c0_33] : memref<32x32xf32, #tpu.memory_space<vmem>>, vector<32x32xf32>
    %cst_34 = arith.constant dense<0.000000e+00> : vector<2x32xf32>
    %52 = tpu.matmul %50, %51, %cst_34 {dimension_numbers = #tpu.dot_dimension_numbers<[1], [0], [0], [1], [0, 0, 1, 1], [], []>} : vector<2x32xf32>, vector<32x32xf32>, vector<2x32xf32> -> vector<2x32xf32>
    %c0_35 = arith.constant 0 : index
    %c0_36 = arith.constant 0 : index
    %53 = vector.load %arg14[%c0_35, %c0_36] : memref<1x32xf32, #tpu.memory_space<vmem>>, vector<1x32xf32>
    %54 = vector.broadcast %53 : vector<1x32xf32> to vector<2x32xf32>
    %55 = arith.addf %52, %54 : vector<2x32xf32>
    %cst_37 = arith.constant 0.000000e+00 : f32
    %56 = vector.broadcast %cst_37 : f32 to vector<2x32xf32>
    %57 = arith.maximumf %55, %56 : vector<2x32xf32>
    %c0_38 = arith.constant 0 : index
    %c0_39 = arith.constant 0 : index
    %58 = vector.load %arg15[%c0_38, %c0_39] : memref<32x8xf32, #tpu.memory_space<vmem>>, vector<32x8xf32>
    %cst_40 = arith.constant dense<0.000000e+00> : vector<2x8xf32>
    %59 = tpu.matmul %57, %58, %cst_40 {dimension_numbers = #tpu.dot_dimension_numbers<[1], [0], [0], [1], [0, 0, 1, 1], [], []>} : vector<2x32xf32>, vector<32x8xf32>, vector<2x8xf32> -> vector<2x8xf32>
    %c0_41 = arith.constant 0 : index
    %c0_42 = arith.constant 0 : index
    %60 = vector.load %arg16[%c0_41, %c0_42] : memref<1x8xf32, #tpu.memory_space<vmem>>, vector<1x8xf32>
    %61 = vector.broadcast %60 : vector<1x8xf32> to vector<2x8xf32>
    %62 = arith.addf %59, %61 : vector<2x8xf32>
    %63 = vector.extract_strided_slice %62 {offsets = [0, 0], sizes = [2, 4], strides = [1, 1]} : vector<2x8xf32> to vector<2x4xf32>
    %64 = vector.extract_strided_slice %62 {offsets = [0, 4], sizes = [2, 4], strides = [1, 1]} : vector<2x8xf32> to vector<2x4xf32>
    %65 = math.tanh %64 : vector<2x4xf32>
    %cst_43 = arith.constant 1.000000e+00 : f32
    %66 = vector.broadcast %cst_43 : f32 to vector<2x4xf32>
    %67 = arith.addf %65, %66 : vector<2x4xf32>
    %cst_44 = arith.constant 6.000000e+00 : f32
    %68 = vector.broadcast %cst_44 : f32 to vector<2x4xf32>
    %69 = arith.mulf %68, %67 : vector<2x4xf32>
    %cst_45 = arith.constant -1.000000e+01 : f32
    %70 = vector.broadcast %cst_45 : f32 to vector<2x4xf32>
    %71 = arith.addf %70, %69 : vector<2x4xf32>
    %72 = math.exp %71 : vector<2x4xf32>
    %c0_46 = arith.constant 0 : index
    %c0_47 = arith.constant 0 : index
    %73 = vector.load %arg2[%c0_46, %c0_47] : memref<2x4xf32, #tpu.memory_space<vmem>>, vector<2x4xf32>
    %74 = arith.mulf %73, %72 : vector<2x4xf32>
    %75 = arith.addf %63, %74 : vector<2x4xf32>
    %cst_48 = arith.constant -5.000000e-01 : f32
    %76 = vector.broadcast %cst_48 : f32 to vector<2x4xf32>
    %77 = arith.mulf %76, %73 : vector<2x4xf32>
    %78 = arith.mulf %77, %73 : vector<2x4xf32>
    %79 = arith.subf %78, %71 : vector<2x4xf32>
    %cst_49 = arith.constant dense<0.000000e+00> : vector<2xf32>
    %80 = vector.multi_reduction <add>, %79, %cst_49 [1] : vector<2x4xf32> to vector<2xf32>
    %81 = vector.shape_cast %80 : vector<2xf32> to vector<2x1xf32>
    %cst_50 = arith.constant 3.67575407 : f32
    %82 = vector.broadcast %cst_50 : f32 to vector<2x1xf32>
    %83 = arith.subf %81, %82 : vector<2x1xf32>
    %84 = math.tanh %63 : vector<2x4xf32>
    %85 = math.tanh %75 : vector<2x4xf32>
    %86 = arith.mulf %85, %85 : vector<2x4xf32>
    %cst_51 = arith.constant 1.000000e+00 : f32
    %87 = vector.broadcast %cst_51 : f32 to vector<2x4xf32>
    %88 = arith.subf %87, %86 : vector<2x4xf32>
    %cst_52 = arith.constant 0.000000e+00 : f32
    %89 = vector.broadcast %cst_52 : f32 to vector<2x4xf32>
    %90 = arith.maximumf %88, %89 : vector<2x4xf32>
    %cst_53 = arith.constant 9.99999997E-7 : f32
    %91 = vector.broadcast %cst_53 : f32 to vector<2x4xf32>
    %92 = arith.addf %90, %91 : vector<2x4xf32>
    %93 = math.log %92 : vector<2x4xf32>
    %cst_54 = arith.constant dense<0.000000e+00> : vector<2xf32>
    %94 = vector.multi_reduction <add>, %93, %cst_54 [1] : vector<2x4xf32> to vector<2xf32>
    %95 = vector.shape_cast %94 : vector<2xf32> to vector<2x1xf32>
    %96 = arith.subf %83, %95 : vector<2x1xf32>
    %cst_55 = arith.constant 0.000000e+00 : f32
    %97 = vector.broadcast %cst_55 : f32 to vector<2x128xf32>
    %c0_56 = arith.constant 0 : index
    %c0_57 = arith.constant 0 : index
    %98 = vector.load %arg17[%c0_56, %c0_57] : memref<2x128xf32, #tpu.memory_space<vmem>>, vector<2x128xf32>
    tpu.vector_store %arg17[%c0_56, %c0_57], %97 {strides = array<i32>} : memref<2x128xf32, #tpu.memory_space<vmem>>, vector<2x128xf32>,
    %c0_58 = arith.constant 0 : index
    %c0_59 = arith.constant 0 : index
    %99 = vector.load %arg17[%c0_58, %c0_59] : memref<2x128xf32, #tpu.memory_space<vmem>>, vector<2x4xf32>
    tpu.vector_store %arg17[%c0_58, %c0_59], %84 {strides = array<i32>} : memref<2x128xf32, #tpu.memory_space<vmem>>, vector<2x4xf32>,
    %c0_60 = arith.constant 0 : index
    %c4 = arith.constant 4 : index
    %100 = vector.load %arg17[%c0_60, %c4] : memref<2x128xf32, #tpu.memory_space<vmem>>, vector<2x4xf32>
    tpu.vector_store %arg17[%c0_60, %c4], %85 {strides = array<i32>} : memref<2x128xf32, #tpu.memory_space<vmem>>, vector<2x4xf32>,
    %c0_61 = arith.constant 0 : index
    %c8 = arith.constant 8 : index
    %101 = vector.load %arg17[%c0_61, %c8] : memref<2x128xf32, #tpu.memory_space<vmem>>, vector<2x4xf32>
    tpu.vector_store %arg17[%c0_61, %c8], %71 {strides = array<i32>} : memref<2x128xf32, #tpu.memory_space<vmem>>, vector<2x4xf32>,
    %102 = vector.shape_cast %96 : vector<2x1xf32> to vector<2x1xf32>
    %103 = vector.broadcast %102 : vector<2x1xf32> to vector<2x4xf32>
    %c0_62 = arith.constant 0 : index
    %c12 = arith.constant 12 : index
    %104 = vector.load %arg17[%c0_62, %c12] : memref<2x128xf32, #tpu.memory_space<vmem>>, vector<2x4xf32>
    tpu.vector_store %arg17[%c0_62, %c12], %103 {strides = array<i32>} : memref<2x128xf32, #tpu.memory_space<vmem>>, vector<2x4xf32>,
    return
  }
  func.func @transform_0(%arg0: i32) -> (i32, i32) {
    %c0_i32 = arith.constant 0 : i32
    %c0_i32_0 = arith.constant 0 : i32
    return %arg0, %c0_i32 : i32, i32
  }
  func.func @transform_1(%arg0: i32) -> (i32, i32) {
    %c0_i32 = arith.constant 0 : i32
    %c0_i32_0 = arith.constant 0 : i32
    return %arg0, %c0_i32 : i32, i32
  }
  func.func @transform_2(%arg0: i32) -> (i32, i32) {
    %c0_i32 = arith.constant 0 : i32
    %c0_i32_0 = arith.constant 0 : i32
    %c0_i32_1 = arith.constant 0 : i32
    return %c0_i32, %c0_i32_0 : i32, i32
  }
  func.func @transform_3(%arg0: i32) -> (i32, i32) {
    %c0_i32 = arith.constant 0 : i32
    %c0_i32_0 = arith.constant 0 : i32
    %c0_i32_1 = arith.constant 0 : i32
    return %c0_i32, %c0_i32_0 : i32, i32
  }
  func.func @transform_4(%arg0: i32) -> (i32, i32) {
    %c0_i32 = arith.constant 0 : i32
    %c0_i32_0 = arith.constant 0 : i32
    %c0_i32_1 = arith.constant 0 : i32
    return %c0_i32, %c0_i32_0 : i32, i32
  }
  func.func @transform_5(%arg0: i32) -> (i32, i32) {
    %c0_i32 = arith.constant 0 : i32
    %c0_i32_0 = arith.constant 0 : i32
    %c0_i32_1 = arith.constant 0 : i32
    return %c0_i32, %c0_i32_0 : i32, i32
  }
  func.func @transform_6(%arg0: i32) -> (i32, i32) {
    %c0_i32 = arith.constant 0 : i32
    %c0_i32_0 = arith.constant 0 : i32
    %c0_i32_1 = arith.constant 0 : i32
    return %c0_i32, %c0_i32_0 : i32, i32
  }
  func.func @transform_7(%arg0: i32) -> (i32, i32) {
    %c0_i32 = arith.constant 0 : i32
    %c0_i32_0 = arith.constant 0 : i32
    %c0_i32_1 = arith.constant 0 : i32
    return %c0_i32, %c0_i32_0 : i32, i32
  }
  func.func @transform_8(%arg0: i32) -> (i32, i32) {
    %c0_i32 = arith.constant 0 : i32
    %c0_i32_0 = arith.constant 0 : i32
    %c0_i32_1 = arith.constant 0 : i32
    return %c0_i32, %c0_i32_0 : i32, i32
  }
  func.func @transform_9(%arg0: i32) -> (i32, i32) {
    %c0_i32 = arith.constant 0 : i32
    %c0_i32_0 = arith.constant 0 : i32
    %c0_i32_1 = arith.constant 0 : i32
    return %c0_i32, %c0_i32_0 : i32, i32
  }
  func.func @transform_10(%arg0: i32) -> (i32, i32) {
    %c0_i32 = arith.constant 0 : i32
    %c0_i32_0 = arith.constant 0 : i32
    %c0_i32_1 = arith.constant 0 : i32
    return %c0_i32, %c0_i32_0 : i32, i32
  }
  func.func @transform_11(%arg0: i32) -> (i32, i32) {
    %c0_i32 = arith.constant 0 : i32
    %c0_i32_0 = arith.constant 0 : i32
    %c0_i32_1 = arith.constant 0 : i32
    return %c0_i32, %c0_i32_0 : i32, i32
  }
  func.func @transform_12(%arg0: i32) -> (i32, i32) {
    %c0_i32 = arith.constant 0 : i32
    %c0_i32_0 = arith.constant 0 : i32
    %c0_i32_1 = arith.constant 0 : i32
    return %c0_i32, %c0_i32_0 : i32, i32
  }
  func.func @transform_13(%arg0: i32) -> (i32, i32) {
    %c0_i32 = arith.constant 0 : i32
    %c0_i32_0 = arith.constant 0 : i32
    %c0_i32_1 = arith.constant 0 : i32
    return %c0_i32, %c0_i32_0 : i32, i32
  }
  func.func @transform_14(%arg0: i32) -> (i32, i32) {
    %c0_i32 = arith.constant 0 : i32
    %c0_i32_0 = arith.constant 0 : i32
    %c0_i32_1 = arith.constant 0 : i32
    return %c0_i32, %c0_i32_0 : i32, i32
  }
  func.func @transform_15(%arg0: i32) -> (i32, i32) {
    %c0_i32 = arith.constant 0 : i32
    %c0_i32_0 = arith.constant 0 : i32
    %c0_i32_1 = arith.constant 0 : i32
    return %c0_i32, %c0_i32_0 : i32, i32
  }
  func.func @transform_16(%arg0: i32) -> (i32, i32) {
    %c0_i32 = arith.constant 0 : i32
    %c0_i32_0 = arith.constant 0 : i32
    return %arg0, %c0_i32 : i32, i32
  }
}

</mosaic_0001>

<bundles_post_ra>
// kernel: actor_forward.1
= control target key start
LH: loop header
LB: loop body
LE: loop exit
PB: predicated region body
PF: predicated region fallthrough
CT: control target
= control target key end

     0   :  { %vm1315_vm0 = vcmask 64512   ;;  %vm1495_vm1 = vcmask 588800   ;;  %vm1569_vm2 = vcmask 254976   ;;  %vm2673_vm3 = vmmov 0   ;;  %s2674_s18 = smov 124   ;;  %s2675_s19 = smov 4   ;;  %s4846_s2 = inlined_call_operand.vmem [shape: f32[1024,392], index: 2, kind: input, shape index: {}]   ;;  %s4847_s0 = inlined_call_operand.vmem [shape: f32[2,1024], index: 0, kind: input, shape index: {}]   ;;  %s4848_s4 = inlined_call_operand.vmem [shape: f32[392,200], index: 4, kind: input, shape index: {}]   ;;  %s4849_s6 = inlined_call_operand.vmem [shape: f32[200,32], index: 6, kind: input, shape index: {}]   ;;  %s4850_s3 = inlined_call_operand.vmem [shape: f32[1,392], index: 3, kind: input, shape index: {}]   ;;  %s4851_s5 = inlined_call_operand.vmem [shape: f32[1,200], index: 5, kind: input, shape index: {}]   ;;  %s4852_s7 = inlined_call_operand.vmem [shape: f32[1,32], index: 7, kind: input, shape index: {}]   ;;  %s4853_s10 = inlined_call_operand.vmem [shape: f32[32,32], index: 10, kind: input, shape index: {}]   ;;  %s4854_s8 = inlined_call_operand.vmem [shape: f32[1,32], index: 8, kind: input, shape index: {}]   ;;  %s4855_s12 = inlined_call_operand.vmem [shape: f32[32,32], index: 12, kind: input, shape index: {}]   ;;  %s4856_s9 = inlined_call_operand.vmem [shape: f32[1,32], index: 9, kind: input, shape index: {}]   ;;  %s4857_s11 = inlined_call_operand.vmem [shape: f32[1,32], index: 11, kind: input, shape index: {}]   ;;  %s4858_s14 = inlined_call_operand.vmem [shape: f32[32,8], index: 14, kind: input, shape index: {}]   ;;  %s4859_s13 = inlined_call_operand.vmem [shape: f32[1,32], index: 13, kind: input, shape index: {}]   ;;  %s4860_s16 = inlined_call_operand.vmem [shape: f32[2,128], index: 16, kind: output, shape index: {}]   ;;  %s4861_s15 = inlined_call_operand.vmem [shape: f32[1,8], index: 15, kind: input, shape index: {}]   ;;  %s4862_s1 = inlined_call_operand.vmem [shape: f32[2,4], index: 1, kind: input, shape index: {}]  }
   0x1   :  { %4864 = sst [smem:[#allocation2_spill]] %s4846_s2  ;;  %vm1611_vm4 = vcmask 261120   ;;  %vm1875_vm5 = vcmask 25600   ;;  %vm1897_vm6 = vcmask 58400   ;;  %vm1902_vm7 = vcmask 91200  }
   0x2   :  { %s4865_s23 = sld [smem:[#allocation2_spill]]  ;;  %vm1904_vm8 = vcmask 124000  }
   0x8   :  { %v56_v0 = vld [vmem:[%s4865_s23 + $0x8] sm:$0xff]  ;;  %v58_v2 = vld [vmem:[%s4865_s23 + $0x18] sm:$0xff]  ;;  %v55_v5 = vld [vmem:[%s4865_s23] sm:$0xff] }
   0x9   :  { %v60_v1 = vld [vmem:[%s4865_s23 + $0x28] sm:$0xff]  ;;  %v62_v4 = vld [vmem:[%s4865_s23 + $0x38] sm:$0xff]  ;;  %v59_v6 = vld [vmem:[%s4865_s23 + $0x20] sm:$0xff] }
   0xa   :  { %v1970_v3 = vpack.c.bf16 %v60_v1, %v56_v0  ;;  %v2226_v7 = vpack.c.bf16 %v62_v4, %v58_v2  ;;  %v1972_v8 = vpack.c.bf16 %v59_v6, %v55_v5  ;;  %v57_v9 = vld [vmem:[%s4865_s23 + $0x10] sm:$0xff]  ;;  %v64_v11 = vld [vmem:[%s4865_s23 + $0x48] sm:$0xff]  ;;  %v66_v14 = vld [vmem:[%s4865_s23 + $0x58] sm:$0xff] }
   0xb   :  { %v61_v10 = vld [vmem:[%s4865_s23 + $0x30] sm:$0xff]  ;;  %v68_v13 = vld [vmem:[%s4865_s23 + $0x68] sm:$0xff]  ;;  %v70_v15 = vld [vmem:[%s4865_s23 + $0x78] sm:$0xff] }
   0xc   :  { %1971 = vmatprep.subr.bf16.mxu0 %v1970_v3  ;;  %v2228_v12 = vpack.c.bf16 %v61_v10, %v57_v9  ;;  %2227 = vmatprep.subr.bf16.mxu1 %v2226_v7  ;;  %v1974_v16 = vpack.c.bf16 %v68_v13, %v64_v11  ;;  %v2230_v17 = vpack.c.bf16 %v70_v15, %v66_v14  ;;  %v63_v18 = vld [vmem:[%s4865_s23 + $0x40] sm:$0xff]  ;;  %v65_v20 = vld [vmem:[%s4865_s23 + $0x50] sm:$0xff]  ;;  %v72_v23 = vld [vmem:[%s4865_s23 + $0x88] sm:$0xff] }
   0xd   :  { %1973 = vmatpush1.bf16.msra.mxu0 %v1972_v8  ;;  %v67_v19 = vld [vmem:[%s4865_s23 + $0x60] sm:$0xff]  ;;  %v69_v22 = vld [vmem:[%s4865_s23 + $0x70] sm:$0xff]  ;;  %v76_v24 = vld [vmem:[%s4865_s23 + $0xa8] sm:$0xff] }
   0xe   :  { %2229 = vmatpush1.bf16.msra.mxu1 %v2228_v12  ;;  %v1976_v21 = vpack.c.bf16 %v67_v19, %v63_v18  ;;  %1975 = vmatprep.subr.bf16.mxu0 %v1974_v16  ;;  %v2232_v25 = vpack.c.bf16 %v69_v22, %v65_v20  ;;  %v1978_v26 = vpack.c.bf16 %v76_v24, %v72_v23  ;;  %v74_v27 = vld [vmem:[%s4865_s23 + $0x98] sm:$0xff]  ;;  %v71_v29 = vld [vmem:[%s4865_s23 + $0x80] sm:$0xff]  ;;  %v73_v32 = vld [vmem:[%s4865_s23 + $0x90] sm:$0xff] }
   0xf   :  { %2231 = vmatprep.subr.bf16.mxu1 %v2230_v17  ;;  %v78_v28 = vld [vmem:[%s4865_s23 + $0xb8] sm:$0xff]  ;;  %v75_v31 = vld [vmem:[%s4865_s23 + $0xa0] sm:$0xff]  ;;  %v77_v33 = vld [vmem:[%s4865_s23 + $0xb0] sm:$0xff] }
  0x10   :  { %v2234_v30 = vpack.c.bf16 %v78_v28, %v74_v27  ;;  %v1980_v34 = vpack.c.bf16 %v75_v31, %v71_v29  ;;  %v80_v35 = vld [vmem:[%s4865_s23 + $0xc8] sm:$0xff]  ;;  %v82_v37 = vld [vmem:[%s4865_s23 + $0xd8] sm:$0xff]  ;;  %v2236_v38 = vpack.c.bf16 %v77_v33, %v73_v32  ;;  %v79_v41 = vld [vmem:[%s4865_s23 + $0xc0] sm:$0xff] }
  0x11   :  { %1977 = vmatpush1.bf16.msra.mxu0 %v1976_v21  ;;  %v84_v36 = vld [vmem:[%s4865_s23 + $0xe8] sm:$0xff]  ;;  %v86_v40 = vld [vmem:[%s4865_s23 + $0xf8] sm:$0xff]  ;;  %v83_v42 = vld [vmem:[%s4865_s23 + $0xe0] sm:$0xff] }
  0x12   :  { %2233 = vmatpush1.bf16.msra.mxu1 %v2232_v25  ;;  %1979 = vmatprep.subr.bf16.mxu0 %v1978_v26  ;;  %v1982_v39 = vpack.c.bf16 %v84_v36, %v80_v35  ;;  %v2238_v43 = vpack.c.bf16 %v86_v40, %v82_v37  ;;  %v81_v44 = vld [vmem:[%s4865_s23 + $0xd0] sm:$0xff]  ;;  %v88_v46 = vld [vmem:[%s4865_s23 + $0x108] sm:$0xff]  ;;  %v90_v48 = vld [vmem:[%s4865_s23 + $0x118] sm:$0xff]  ;;  %v1984_v50 = vpack.c.bf16 %v83_v42, %v79_v41 }
  0x13   :  { %2235 = vmatprep.subr.bf16.mxu1 %v2234_v30  ;;  %v85_v45 = vld [vmem:[%s4865_s23 + $0xf0] sm:$0xff]  ;;  %v92_v47 = vld [vmem:[%s4865_s23 + $0x128] sm:$0xff]  ;;  %v94_v49 = vld [vmem:[%s4865_s23 + $0x138] sm:$0xff] }
  0x14   :  { %v2240_v51 = vpack.c.bf16 %v85_v45, %v81_v44  ;;  %v1986_v52 = vpack.c.bf16 %v92_v47, %v88_v46  ;;  %v87_v53 = vld [vmem:[%s4865_s23 + $0x100] sm:$0xff]  ;;  %v89_v55 = vld [vmem:[%s4865_s23 + $0x110] sm:$0xff]  ;;  %v2242_v56 = vpack.c.bf16 %v94_v49, %v90_v48  ;;  %v96_v58 = vld [vmem:[%s4865_s23 + $0x148] sm:$0xff]  ;;  %v569_v46 = vlaneseq }
  0x15   :  { %1981 = vmatpush1.bf16.msra.mxu0 %v1980_v34  ;;  %v91_v54 = vld [vmem:[%s4865_s23 + $0x120] sm:$0xff]  ;;  %v93_v57 = vld [vmem:[%s4865_s23 + $0x130] sm:$0xff]  ;;  %v100_v59 = vld [vmem:[%s4865_s23 + $0x168] sm:$0xff]  ;;  %v2670_v47 = vmov 1983009808  }
  0x16   :  { %2237 = vmatpush1.bf16.msra.mxu1 %v2236_v38  ;;  %1983 = vmatprep.subr.bf16.mxu0 %v1982_v39  ;;  %v98_v60 = vld [vmem:[%s4865_s23 + $0x158] sm:$0xff]  ;;  %v1988_v62 = vpack.c.bf16 %v91_v54, %v87_v53  ;;  %v2244_v63 = vpack.c.bf16 %v93_v57, %v89_v55  ;;  %v1990_v0 = vpack.c.bf16 %v100_v59, %v96_v58  ;;  %v95_v1 = vld [vmem:[%s4865_s23 + $0x140] sm:$0xff]  ;;  %v97_v3 = vld [vmem:[%s4865_s23 + $0x150] sm:$0xff]  ;;  %v593_v48 = vunpack.c.l.s4 %v2670_v47 }
  0x17   :  { %2239 = vmatprep.subr.bf16.mxu1 %v2238_v43  ;;  %v102_v61 = vld [vmem:[%s4865_s23 + $0x178] sm:$0xff]  ;;  %v99_v2 = vld [vmem:[%s4865_s23 + $0x160] sm:$0xff]  ;;  %v101_v5 = vld [vmem:[%s4865_s23 + $0x170] sm:$0xff] }
  0x18   :  { %v2246_v4 = vpack.c.bf16 %v102_v61, %v98_v60  ;;  %v104_v6 = vld [vmem:[%s4865_s23 + $0x188] sm:$0xff]  ;;  %v106_v8 = vld [vmem:[%s4865_s23 + $0x198] sm:$0xff]  ;;  %v1992_v10 = vpack.c.bf16 %v99_v2, %v95_v1  ;;  %v2248_v11 = vpack.c.bf16 %v101_v5, %v97_v3  ;;  %v103_v13 = vld [vmem:[%s4865_s23 + $0x180] sm:$0xff]  ;;  %v3013_v61 = vshrl.u32 %v569_v46, 7 }
  0x19   :  { %1985 = vmatpush1.bf16.msra.mxu0 %v1984_v50  ;;  %v108_v7 = vld [vmem:[%s4865_s23 + $0x1a8] sm:$0xff]  ;;  %v110_v9 = vld [vmem:[%s4865_s23 + $0x1b8] sm:$0xff]  ;;  %v107_v14 = vld [vmem:[%s4865_s23 + $0x1a0] sm:$0xff] }
  0x1a   :  { %2241 = vmatpush1.bf16.msra.mxu1 %v2240_v51  ;;  %1987 = vmatprep.subr.bf16.mxu0 %v1986_v52  ;;  %v1994_v12 = vpack.c.bf16 %v108_v7, %v104_v6  ;;  %v105_v15 = vld [vmem:[%s4865_s23 + $0x190] sm:$0xff]  ;;  %v2250_v16 = vpack.c.bf16 %v110_v9, %v106_v8  ;;  %v112_v18 = vld [vmem:[%s4865_s23 + $0x1c8] sm:$0xff]  ;;  %v114_v20 = vld [vmem:[%s4865_s23 + $0x1d8] sm:$0xff]  ;;  %v1996_v22 = vpack.c.bf16 %v107_v14, %v103_v13 }
  0x1b   :  { %2243 = vmatprep.subr.bf16.mxu1 %v2242_v56  ;;  %v109_v17 = vld [vmem:[%s4865_s23 + $0x1b0] sm:$0xff]  ;;  %v116_v19 = vld [vmem:[%s4865_s23 + $0x1e8] sm:$0xff]  ;;  %v118_v21 = vld [vmem:[%s4865_s23 + $0x1f8] sm:$0xff] }
  0x1c   :  { %v2252_v23 = vpack.c.bf16 %v109_v17, %v105_v15  ;;  %v1998_v24 = vpack.c.bf16 %v116_v19, %v112_v18  ;;  %v111_v25 = vld [vmem:[%s4865_s23 + $0x1c0] sm:$0xff]  ;;  %v113_v27 = vld [vmem:[%s4865_s23 + $0x1d0] sm:$0xff]  ;;  %v2254_v28 = vpack.c.bf16 %v118_v21, %v114_v20  ;;  %v120_v30 = vld [vmem:[%s4865_s23 + $0x208] sm:$0xff] }
  0x1d   :  { %1989 = vmatpush1.bf16.msra.mxu0 %v1988_v62  ;;  %v115_v26 = vld [vmem:[%s4865_s23 + $0x1e0] sm:$0xff]  ;;  %v117_v29 = vld [vmem:[%s4865_s23 + $0x1f0] sm:$0xff]  ;;  %v124_v31 = vld [vmem:[%s4865_s23 + $0x228] sm:$0xff]  ;;  %v594_v62 = vunpack.c.0.s8 %v593_v48 }
  0x1e   :  { %2245 = vmatpush1.bf16.msra.mxu1 %v2244_v63  ;;  %1991 = vmatprep.subr.bf16.mxu0 %v1990_v0  ;;  %v122_v32 = vld [vmem:[%s4865_s23 + $0x218] sm:$0xff]  ;;  %v2000_v34 = vpack.c.bf16 %v115_v26, %v111_v25  ;;  %v2256_v35 = vpack.c.bf16 %v117_v29, %v113_v27  ;;  %v2002_v36 = vpack.c.bf16 %v124_v31, %v120_v30  ;;  %v119_v37 = vld [vmem:[%s4865_s23 + $0x200] sm:$0xff]  ;;  %v121_v39 = vld [vmem:[%s4865_s23 + $0x210] sm:$0xff] }
  0x1f   :  { %2247 = vmatprep.subr.bf16.mxu1 %v2246_v4  ;;  %v126_v33 = vld [vmem:[%s4865_s23 + $0x238] sm:$0xff]  ;;  %v123_v38 = vld [vmem:[%s4865_s23 + $0x220] sm:$0xff]  ;;  %v125_v41 = vld [vmem:[%s4865_s23 + $0x230] sm:$0xff] }
  0x20   :  { %v2258_v40 = vpack.c.bf16 %v126_v33, %v122_v32  ;;  %v128_v42 = vld [vmem:[%s4865_s23 + $0x248] sm:$0xff]  ;;  %v130_v44 = vld [vmem:[%s4865_s23 + $0x258] sm:$0xff]  ;;  %v2004_v49 = vpack.c.bf16 %v123_v38, %v119_v37  ;;  %v2260_v50 = vpack.c.bf16 %v125_v41, %v121_v39  ;;  %v127_v52 = vld [vmem:[%s4865_s23 + $0x240] sm:$0xff] }
  0x21   :  { %1993 = vmatpush1.bf16.msra.mxu0 %v1992_v10  ;;  %v132_v43 = vld [vmem:[%s4865_s23 + $0x268] sm:$0xff]  ;;  %v134_v45 = vld [vmem:[%s4865_s23 + $0x278] sm:$0xff]  ;;  %v131_v53 = vld [vmem:[%s4865_s23 + $0x260] sm:$0xff] }
  0x22   :  { %2249 = vmatpush1.bf16.msra.mxu1 %v2248_v11  ;;  %1995 = vmatprep.subr.bf16.mxu0 %v1994_v12  ;;  %v2006_v51 = vpack.c.bf16 %v132_v43, %v128_v42  ;;  %v129_v54 = vld [vmem:[%s4865_s23 + $0x250] sm:$0xff]  ;;  %v2262_v55 = vpack.c.bf16 %v134_v45, %v130_v44  ;;  %v136_v57 = vld [vmem:[%s4865_s23 + $0x288] sm:$0xff]  ;;  %v138_v59 = vld [vmem:[%s4865_s23 + $0x298] sm:$0xff]  ;;  %v2008_v63 = vpack.c.bf16 %v131_v53, %v127_v52 }
  0x23   :  { %2251 = vmatprep.subr.bf16.mxu1 %v2250_v16  ;;  %v133_v56 = vld [vmem:[%s4865_s23 + $0x270] sm:$0xff]  ;;  %v140_v58 = vld [vmem:[%s4865_s23 + $0x2a8] sm:$0xff]  ;;  %v142_v60 = vld [vmem:[%s4865_s23 + $0x2b8] sm:$0xff]  ;;  %v3040_v11 = vsub.s32 %v594_v62, %v3013_v61 }
  0x24   :  { %v2264_v0 = vpack.c.bf16 %v133_v56, %v129_v54  ;;  %v2010_v1 = vpack.c.bf16 %v140_v58, %v136_v57  ;;  %v135_v2 = vld [vmem:[%s4865_s23 + $0x280] sm:$0xff]  ;;  %v137_v4 = vld [vmem:[%s4865_s23 + $0x290] sm:$0xff]  ;;  %v2266_v5 = vpack.c.bf16 %v142_v60, %v138_v59  ;;  %v144_v7 = vld [vmem:[%s4865_s23 + $0x2c8] sm:$0xff] }
  0x25   :  { %1997 = vmatpush1.bf16.msra.mxu0 %v1996_v22  ;;  %v139_v3 = vld [vmem:[%s4865_s23 + $0x2a0] sm:$0xff]  ;;  %v141_v6 = vld [vmem:[%s4865_s23 + $0x2b0] sm:$0xff]  ;;  %v148_v8 = vld [vmem:[%s4865_s23 + $0x2e8] sm:$0xff] }
  0x26   :  { %2253 = vmatpush1.bf16.msra.mxu1 %v2252_v23  ;;  %1999 = vmatprep.subr.bf16.mxu0 %v1998_v24  ;;  %v146_v9 = vld [vmem:[%s4865_s23 + $0x2d8] sm:$0xff]  ;;  %v2012_v12 = vpack.c.bf16 %v139_v3, %v135_v2  ;;  %v143_v13 = vld [vmem:[%s4865_s23 + $0x2c0] sm:$0xff]  ;;  %v2268_v14 = vpack.c.bf16 %v141_v6, %v137_v4  ;;  %v2014_v15 = vpack.c.bf16 %v148_v8, %v144_v7  ;;  %v145_v17 = vld [vmem:[%s4865_s23 + $0x2d0] sm:$0xff] }
  0x27   :  { %2255 = vmatprep.subr.bf16.mxu1 %v2254_v28  ;;  %v150_v10 = vld [vmem:[%s4865_s23 + $0x2f8] sm:$0xff]  ;;  %v147_v16 = vld [vmem:[%s4865_s23 + $0x2e0] sm:$0xff]  ;;  %v149_v18 = vld [vmem:[%s4865_s23 + $0x2f0] sm:$0xff] }
  0x28   :  { %v2270_v19 = vpack.c.bf16 %v150_v10, %v146_v9  ;;  %v152_v20 = vld [vmem:[%s4865_s23 + $0x308] sm:$0xff]  ;;  %v3063_v22 = vld [vmem:[%s4847_s0] sm:$0xff]  ;;  %v154_v23 = vld [vmem:[%s4865_s23 + $0x318] sm:$0xff]  ;;  %v2016_v26 = vpack.c.bf16 %v147_v16, %v143_v13  ;;  %v2272_v27 = vpack.c.bf16 %v149_v18, %v145_v17 }
  0x29   :  { %2001 = vmatpush1.bf16.msra.mxu0 %v2000_v34  ;;  %v156_v21 = vld [vmem:[%s4865_s23 + $0x328] sm:$0xff]  ;;  %v158_v24 = vld [vmem:[%s4865_s23 + $0x338] sm:$0xff]  ;;  %v3073_v25 = vrot.slane %v3063_v22, %v3040_v11  ;;  %v151_v29 = vld [vmem:[%s4865_s23 + $0x300] sm:$0xff]  ;;  %v591_v8 = vcombine.high %v3063_v22, %v3063_v22 }
  0x2a   :  { %2257 = vmatpush1.bf16.msra.mxu1 %v2256_v35  ;;  %2003 = vmatprep.subr.bf16.mxu0 %v2002_v36  ;;  %v2018_v28 = vpack.c.bf16 %v156_v21, %v152_v20  ;;  %v155_v30 = vld [vmem:[%s4865_s23 + $0x320] sm:$0xff]  ;;  %v153_v31 = vld [vmem:[%s4865_s23 + $0x310] sm:$0xff]  ;;  %v2274_v33 = vpack.c.bf16 %v158_v24, %v154_v23  ;;  %v160_v35 = vld [vmem:[%s4865_s23 + $0x348] sm:$0xff] }
  0x2b   :  { %2259 = vmatprep.subr.bf16.mxu1 %v2258_v40  ;;  %v606_v32 = vcombine.high %v3073_v25, %v3073_v25  ;;  %v157_v34 = vld [vmem:[%s4865_s23 + $0x330] sm:$0xff]  ;;  %v164_v36 = vld [vmem:[%s4865_s23 + $0x368] sm:$0xff]  ;;  %v162_v37 = vld [vmem:[%s4865_s23 + $0x358] sm:$0xff]  ;;  %v2020_v39 = vpack.c.bf16 %v155_v30, %v151_v29  ;;  %v3194_v24 = vrot.slane %v591_v8, %v3040_v11 }
  0x2c   :  { %v166_v38 = vld [vmem:[%s4865_s23 + $0x378] sm:$0xff]  ;;  %v2276_v40 = vpack.c.bf16 %v157_v34, %v153_v31  ;;  %v2022_v41 = vpack.c.bf16 %v164_v36, %v160_v35  ;;  %v159_v42 = vld [vmem:[%s4865_s23 + $0x340] sm:$0xff]  ;;  %v161_v44 = vld [vmem:[%s4865_s23 + $0x350] sm:$0xff] }
  0x2d   :  { %2005 = vmatpush1.bf16.msra.mxu0 %v2004_v49  ;;  %697 = vmatprep.mubr.f32.mxu0 %v606_v32  ;;  %v163_v43 = vld [vmem:[%s4865_s23 + $0x360] sm:$0xff]  ;;  %v2278_v45 = vpack.c.bf16 %v166_v38, %v162_v37  ;;  %v165_v46 = vld [vmem:[%s4865_s23 + $0x370] sm:$0xff]  ;;  %v168_v47 = vld [vmem:[%s4865_s23 + $0x388] sm:$0xff]  ;;  %v607_v38 = vcombine.high %v3194_v24, %v3194_v24 }
  0x2e   :  { %2261 = vmatpush1.bf16.msra.mxu1 %v2260_v50  ;;  %2007 = vmatprep.subr.bf16.mxu0 %v2006_v51  ;;  %v172_v48 = vld [vmem:[%s4865_s23 + $0x3a8] sm:$0xff]  ;;  %v170_v49 = vld [vmem:[%s4865_s23 + $0x398] sm:$0xff]  ;;  %v2024_v51 = vpack.c.bf16 %v163_v43, %v159_v42  ;;  %v2280_v52 = vpack.c.bf16 %v165_v46, %v161_v44  ;;  %v167_v54 = vld [vmem:[%s4865_s23 + $0x380] sm:$0xff] }
  0x2f   :  { %2263 = vmatprep.subr.bf16.mxu1 %v2262_v55  ;;  %981 = vmatprep.mubr.f32.mxu1 %v606_v32  ;;  %v174_v50 = vld [vmem:[%s4865_s23 + $0x3b8] sm:$0xff]  ;;  %v2026_v53 = vpack.c.bf16 %v172_v48, %v168_v47  ;;  %v171_v55 = vld [vmem:[%s4865_s23 + $0x3a0] sm:$0xff]  ;;  %v169_v56 = vld [vmem:[%s4865_s23 + $0x390] sm:$0xff] }
  0x30   :  { %v2282_v57 = vpack.c.bf16 %v174_v50, %v170_v49  ;;  %v173_v58 = vld [vmem:[%s4865_s23 + $0x3b0] sm:$0xff]  ;;  %v176_v59 = vld [vmem:[%s4865_s23 + $0x3c8] sm:$0xff]  ;;  %v178_v62 = vld [vmem:[%s4865_s23 + $0x3d8] sm:$0xff] }
  0x31   :  { %2009 = vmatpush1.bf16.msra.mxu0 %v2008_v63  ;;  %v180_v60 = vld [vmem:[%s4865_s23 + $0x3e8] sm:$0xff]  ;;  %v182_v63 = vld [vmem:[%s4865_s23 + $0x3f8] sm:$0xff]  ;;  %v175_v3 = vld [vmem:[%s4865_s23 + $0x3c0] sm:$0xff] }
  0x32   :  { %2265 = vmatpush1.bf16.msra.mxu1 %v2264_v0  ;;  %2011 = vmatprep.subr.bf16.mxu0 %v2010_v1  ;;  %v2028_v0 = vpack.c.bf16 %v171_v55, %v167_v54  ;;  %v2284_v1 = vpack.c.bf16 %v173_v58, %v169_v56  ;;  %v2030_v2 = vpack.c.bf16 %v180_v60, %v176_v59  ;;  %v179_v4 = vld [vmem:[%s4865_s23 + $0x3e0] sm:$0xff]  ;;  %v181_v7 = vld [vmem:[%s4865_s23 + $0x3f0] sm:$0xff]  ;;  %v184_v9 = vld [vmem:[%s4865_s23 + $0x408] sm:$0xff] }
  0x33   :  { %2267 = vmatprep.subr.bf16.mxu1 %v2266_v5  ;;  %v177_v5 = vld [vmem:[%s4865_s23 + $0x3d0] sm:$0xff]  ;;  %v2286_v6 = vpack.c.bf16 %v182_v63, %v178_v62  ;;  %v188_v10 = vld [vmem:[%s4865_s23 + $0x428] sm:$0xff]  ;;  %v190_v13 = vld [vmem:[%s4865_s23 + $0x438] sm:$0xff] }
  0x34   :  { %v2034_v16 = vpack.c.bf16 %v188_v10, %v184_v9  ;;  %v183_v17 = vld [vmem:[%s4865_s23 + $0x400] sm:$0xff]  ;;  %v189_v21 = vld [vmem:[%s4865_s23 + $0x430] sm:$0xff]  ;;  %v192_v22 = vld [vmem:[%s4865_s23 + $0x448] sm:$0xff] }
  0x35   :  { %2013 = vmatpush1.bf16.msra.mxu0 %v2012_v12  ;;  %v186_v12 = vld [vmem:[%s4865_s23 + $0x418] sm:$0xff]  ;;  %v187_v18 = vld [vmem:[%s4865_s23 + $0x420] sm:$0xff]  ;;  %v196_v23 = vld [vmem:[%s4865_s23 + $0x468] sm:$0xff] }
  0x36   :  { %2269 = vmatpush1.bf16.msra.mxu1 %v2268_v14  ;;  %2015 = vmatprep.subr.bf16.mxu0 %v2014_v15  ;;  %v2032_v14 = vpack.c.bf16 %v179_v4, %v175_v3  ;;  %v2288_v15 = vpack.c.bf16 %v181_v7, %v177_v5  ;;  %v2290_v20 = vpack.c.bf16 %v190_v13, %v186_v12  ;;  %v191_v31 = vld [vmem:[%s4865_s23 + $0x440] sm:$0xff]  ;;  %v197_v35 = vld [vmem:[%s4865_s23 + $0x470] sm:$0xff]  ;;  %v200_v36 = vld [vmem:[%s4865_s23 + $0x488] sm:$0xff] }
  0x37   :  { %2271 = vmatprep.subr.bf16.mxu1 %v2270_v19  ;;  %v185_v19 = vld [vmem:[%s4865_s23 + $0x410] sm:$0xff]  ;;  %v2038_v30 = vpack.c.bf16 %v196_v23, %v192_v22  ;;  %v195_v32 = vld [vmem:[%s4865_s23 + $0x460] sm:$0xff]  ;;  %v204_v37 = vld [vmem:[%s4865_s23 + $0x4a8] sm:$0xff] }
  0x38   :  { %v2292_v29 = vpack.c.bf16 %v189_v21, %v185_v19  ;;  %v2042_v43 = vpack.c.bf16 %v204_v37, %v200_v36  ;;  %v199_v44 = vld [vmem:[%s4865_s23 + $0x480] sm:$0xff]  ;;  %v201_v46 = vld [vmem:[%s4865_s23 + $0x490] sm:$0xff]  ;;  %v208_v48 = vld [vmem:[%s4865_s23 + $0x4c8] sm:$0xff] }
  0x39   :  { %2017 = vmatpush1.bf16.msra.mxu0 %v2016_v26  ;;  %v194_v26 = vld [vmem:[%s4865_s23 + $0x458] sm:$0xff]  ;;  %v212_v49 = vld [vmem:[%s4865_s23 + $0x4e8] sm:$0xff]  ;;  %v207_v55 = vld [vmem:[%s4865_s23 + $0x4c0] sm:$0xff] }
  0x3a   :  { %2273 = vmatpush1.bf16.msra.mxu1 %v2272_v27  ;;  %2019 = vmatprep.subr.bf16.mxu0 %v2018_v28  ;;  %v198_v27 = vld [vmem:[%s4865_s23 + $0x478] sm:$0xff]  ;;  %v2036_v28 = vpack.c.bf16 %v187_v18, %v183_v17  ;;  %v2046_v54 = vpack.c.bf16 %v212_v49, %v208_v48  ;;  %v211_v56 = vld [vmem:[%s4865_s23 + $0x4e0] sm:$0xff]  ;;  %v213_v59 = vld [vmem:[%s4865_s23 + $0x4f0] sm:$0xff] }
  0x3b   :  { %2275 = vmatprep.subr.bf16.mxu1 %v2274_v33  ;;  %v193_v33 = vld [vmem:[%s4865_s23 + $0x450] sm:$0xff]  ;;  %v2294_v34 = vpack.c.bf16 %v198_v27, %v194_v26  ;;  %v210_v50 = vld [vmem:[%s4865_s23 + $0x4d8] sm:$0xff]  ;;  %v216_v60 = vld [vmem:[%s4865_s23 + $0x508] sm:$0xff] }
  0x3c   :  { %v2296_v42 = vpack.c.bf16 %v197_v35, %v193_v33  ;;  %v220_v62 = vld [vmem:[%s4865_s23 + $0x528] sm:$0xff]  ;;  %v218_v63 = vld [vmem:[%s4865_s23 + $0x518] sm:$0xff]  ;;  %v215_v4 = vld [vmem:[%s4865_s23 + $0x500] sm:$0xff] }
  0x3d   :  { %2021 = vmatpush1.bf16.msra.mxu0 %v2020_v39  ;;  %v202_v39 = vld [vmem:[%s4865_s23 + $0x498] sm:$0xff]  ;;  %v2050_v3 = vpack.c.bf16 %v220_v62, %v216_v60  ;;  %v219_v5 = vld [vmem:[%s4865_s23 + $0x520] sm:$0xff]  ;;  %v221_v8 = vld [vmem:[%s4865_s23 + $0x530] sm:$0xff] }
  0x3e   :  { %2277 = vmatpush1.bf16.msra.mxu1 %v2276_v40  ;;  %2023 = vmatprep.subr.bf16.mxu0 %v2022_v41  ;;  %v206_v40 = vld [vmem:[%s4865_s23 + $0x4b8] sm:$0xff]  ;;  %v2040_v41 = vpack.c.bf16 %v195_v32, %v191_v31  ;;  %v224_v9 = vld [vmem:[%s4865_s23 + $0x548] sm:$0xff]  ;;  %v223_v17 = vld [vmem:[%s4865_s23 + $0x540] sm:$0xff] }
  0x3f   :  { %2279 = vmatprep.subr.bf16.mxu1 %v2278_v45  ;;  %v203_v45 = vld [vmem:[%s4865_s23 + $0x4a0] sm:$0xff]  ;;  %v2298_v47 = vpack.c.bf16 %v206_v40, %v202_v39  ;;  %v228_v10 = vld [vmem:[%s4865_s23 + $0x568] sm:$0xff]  ;;  %v226_v12 = vld [vmem:[%s4865_s23 + $0x558] sm:$0xff] }
  0x40   :  { %v230_v13 = vld [vmem:[%s4865_s23 + $0x578] sm:$0xff]  ;;  %v227_v18 = vld [vmem:[%s4865_s23 + $0x560] sm:$0xff]  ;;  %v225_v19 = vld [vmem:[%s4865_s23 + $0x550] sm:$0xff] }
  0x41   :  { %2025 = vmatpush1.bf16.msra.mxu0 %v2024_v51  ;;  %v214_v51 = vld [vmem:[%s4865_s23 + $0x4f8] sm:$0xff]  ;;  %v229_v21 = vld [vmem:[%s4865_s23 + $0x570] sm:$0xff]  ;;  %v232_v22 = vld [vmem:[%s4865_s23 + $0x588] sm:$0xff] }
  0x42   :  { %2281 = vmatpush1.bf16.msra.mxu1 %v2280_v52  ;;  %2027 = vmatprep.subr.bf16.mxu0 %v2026_v53  ;;  %v2044_v52 = vpack.c.bf16 %v203_v45, %v199_v44  ;;  %v2302_v58 = vpack.c.bf16 %v214_v51, %v210_v50  ;;  %v236_v23 = vld [vmem:[%s4865_s23 + $0x5a8] sm:$0xff]  ;;  %v234_v26 = vld [vmem:[%s4865_s23 + $0x598] sm:$0xff]  ;;  %v231_v31 = vld [vmem:[%s4865_s23 + $0x580] sm:$0xff] }
  0x43   :  { %2283 = vmatprep.subr.bf16.mxu1 %v2282_v57  ;;  %v209_v57 = vld [vmem:[%s4865_s23 + $0x4d0] sm:$0xff]  ;;  %v238_v27 = vld [vmem:[%s4865_s23 + $0x5b8] sm:$0xff]  ;;  %v235_v32 = vld [vmem:[%s4865_s23 + $0x5a0] sm:$0xff] }
  0x44   :  { %v233_v33 = vld [vmem:[%s4865_s23 + $0x590] sm:$0xff]  ;;  %v240_v36 = vld [vmem:[%s4865_s23 + $0x5c8] sm:$0xff]  ;;  %v246_v39 = vld [vmem:[%s4865_s23 + $0x5f8] sm:$0xff]  ;;  %v2060_v40 = vpack.c.bf16 %v235_v32, %v231_v31 }
  0x45   :  { %2029 = vmatpush1.bf16.msra.mxu0 %v2028_v0  ;;  %v222_v0 = vld [vmem:[%s4865_s23 + $0x538] sm:$0xff]  ;;  %v237_v35 = vld [vmem:[%s4865_s23 + $0x5b0] sm:$0xff]  ;;  %v244_v37 = vld [vmem:[%s4865_s23 + $0x5e8] sm:$0xff] }
  0x46   :  { %2285 = vmatpush1.bf16.msra.mxu1 %v2284_v1  ;;  %2031 = vmatprep.subr.bf16.mxu0 %v2030_v2  ;;  %v2048_v1 = vpack.c.bf16 %v211_v56, %v207_v55  ;;  %v2304_v2 = vpack.c.bf16 %v213_v59, %v209_v57  ;;  %v2306_v7 = vpack.c.bf16 %v222_v0, %v218_v63  ;;  %v243_v44 = vld [vmem:[%s4865_s23 + $0x5e0] sm:$0xff]  ;;  %v241_v45 = vld [vmem:[%s4865_s23 + $0x5d0] sm:$0xff]  ;;  %v252_v48 = vld [vmem:[%s4865_s23 + $0x628] sm:$0xff] }
  0x47   :  { %2287 = vmatprep.subr.bf16.mxu1 %v2286_v6  ;;  %v217_v6 = vld [vmem:[%s4865_s23 + $0x510] sm:$0xff]  ;;  %v250_v49 = vld [vmem:[%s4865_s23 + $0x618] sm:$0xff]  ;;  %v251_v55 = vld [vmem:[%s4865_s23 + $0x620] sm:$0xff] }
  0x48   :  { %v254_v50 = vld [vmem:[%s4865_s23 + $0x638] sm:$0xff]  ;;  %v249_v56 = vld [vmem:[%s4865_s23 + $0x610] sm:$0xff]  ;;  %v256_v59 = vld [vmem:[%s4865_s23 + $0x648] sm:$0xff] }
  0x49   :  { %2033 = vmatpush1.bf16.msra.mxu0 %v2032_v14  ;;  %v2052_v14 = vpack.c.bf16 %v219_v5, %v215_v4  ;;  %v2322_v57 = vpack.c.bf16 %v254_v50, %v250_v49  ;;  %v260_v60 = vld [vmem:[%s4865_s23 + $0x668] sm:$0xff]  ;;  %v258_v62 = vld [vmem:[%s4865_s23 + $0x658] sm:$0xff]  ;;  %v259_v4 = vld [vmem:[%s4865_s23 + $0x660] sm:$0xff] }
  0x4a   :  { %2289 = vmatpush1.bf16.msra.mxu1 %v2288_v15  ;;  %2035 = vmatprep.subr.bf16.mxu0 %v2034_v16  ;;  %v2308_v15 = vpack.c.bf16 %v221_v8, %v217_v6  ;;  %v2054_v16 = vpack.c.bf16 %v228_v10, %v224_v9  ;;  %v262_v63 = vld [vmem:[%s4865_s23 + $0x678] sm:$0xff]  ;;  %v257_v5 = vld [vmem:[%s4865_s23 + $0x650] sm:$0xff]  ;;  %v264_v8 = vld [vmem:[%s4865_s23 + $0x688] sm:$0xff] }
  0x4b   :  { %2291 = vmatprep.subr.bf16.mxu1 %v2290_v20  ;;  %v2310_v20 = vpack.c.bf16 %v230_v13, %v226_v12  ;;  %v2326_v6 = vpack.c.bf16 %v262_v63, %v258_v62  ;;  %v268_v9 = vld [vmem:[%s4865_s23 + $0x6a8] sm:$0xff]  ;;  %v266_v10 = vld [vmem:[%s4865_s23 + $0x698] sm:$0xff]  ;;  %v275_v31 = vld [vmem:[%s4865_s23 + $0x6e0] sm:$0xff] }
  0x4c   :  { %698 = vmatmul.mubr.f32.vlgmr.msra.gmra.mrb[0].mxu0 %v3073_v25  ;;  %v270_v12 = vld [vmem:[%s4865_s23 + $0x6b8] sm:$0xff]  ;;  %v273_v32 = vld [vmem:[%s4865_s23 + $0x6d0] sm:$0xff] }
  0x4d   :  { %2037 = vmatpush1.bf16.msra.mxu0 %v2036_v28  ;;  %982 = vmatmul.mubr.f32.vlgmr.msra.gmra.mrb[0].mxu1 %v3073_v25  ;;  %v205_v25 = vld [vmem:[%s4865_s23 + $0x4b0] sm:$0xff]  ;;  %v2056_v28 = vpack.c.bf16 %v227_v18, %v223_v17  ;;  %v267_v17 = vld [vmem:[%s4865_s23 + $0x6a0] sm:$0xff]  ;;  %v294_v49 = vld [vmem:[%s4865_s23 + $0x778] sm:$0xff] }
  0x4e   :  { %2293 = vmatpush1.bf16.msra.mxu1 %v2292_v29  ;;  %2039 = vmatprep.subr.bf16.mxu0 %v2038_v30  ;;  %v2300_v53 = vpack.c.bf16 %v205_v25, %v201_v46  ;;  %v2312_v29 = vpack.c.bf16 %v229_v21, %v225_v19  ;;  %v2058_v30 = vpack.c.bf16 %v236_v23, %v232_v22  ;;  %v248_v25 = vld [vmem:[%s4865_s23 + $0x608] sm:$0xff]  ;;  %v265_v18 = vld [vmem:[%s4865_s23 + $0x690] sm:$0xff]  ;;  %v274_v23 = vld [vmem:[%s4865_s23 + $0x6d8] sm:$0xff] }
  0x4f   :  { %2295 = vmatprep.subr.bf16.mxu1 %v2294_v34  ;;  %768 = vmatprep.mubr.f32.mxu0 %v607_v38  ;;  %v2314_v34 = vpack.c.bf16 %v238_v27, %v234_v26  ;;  %v2330_v19 = vpack.c.bf16 %v270_v12, %v266_v10  ;;  %v272_v21 = vld [vmem:[%s4865_s23 + $0x6c8] sm:$0xff]  ;;  %v278_v26 = vld [vmem:[%s4865_s23 + $0x6f8] sm:$0xff] }
  0x50   :  { %1052 = vmatprep.mubr.f32.mxu1 %v607_v38  ;;  %v242_v38 = vld [vmem:[%s4865_s23 + $0x5d8] sm:$0xff]  ;;  %v276_v22 = vld [vmem:[%s4865_s23 + $0x6e8] sm:$0xff] }
  0x51   :  { %2041 = vmatpush1.bf16.msra.mxu0 %v2040_v41  ;;  %v2316_v41 = vpack.c.bf16 %v237_v35, %v233_v33  ;;  %v2318_v46 = vpack.c.bf16 %v246_v39, %v242_v38  ;;  %v2334_v33 = vpack.c.bf16 %v278_v26, %v274_v23  ;;  %v280_v35 = vld [vmem:[%s4865_s23 + $0x708] sm:$0xff]  ;;  %v286_v38 = vld [vmem:[%s4865_s23 + $0x738] sm:$0xff] }
  0x52   :  { %2297 = vmatpush1.bf16.msra.mxu1 %v2296_v42  ;;  %2043 = vmatprep.subr.bf16.mxu0 %v2042_v43  ;;  %v2062_v42 = vpack.c.bf16 %v244_v37, %v240_v36  ;;  %v239_v43 = vld [vmem:[%s4865_s23 + $0x5c0] sm:$0xff]  ;;  %v284_v36 = vld [vmem:[%s4865_s23 + $0x728] sm:$0xff]  ;;  %v282_v37 = vld [vmem:[%s4865_s23 + $0x718] sm:$0xff] }
  0x53   :  { %2299 = vmatprep.subr.bf16.mxu1 %v2298_v47  ;;  %v245_v47 = vld [vmem:[%s4865_s23 + $0x5f0] sm:$0xff]  ;;  %v2064_v51 = vpack.c.bf16 %v243_v44, %v239_v43  ;;  %v283_v43 = vld [vmem:[%s4865_s23 + $0x720] sm:$0xff]  ;;  %v302_v62 = vld [vmem:[%s4865_s23 + $0x7b8] sm:$0xff] }
  0x54   :  { %v281_v44 = vld [vmem:[%s4865_s23 + $0x710] sm:$0xff]  ;;  %v310_v10 = vld [vmem:[%s4865_s23 + $0x7f8] sm:$0xff] }
  0x55   :  { %2045 = vmatpush1.bf16.msra.mxu0 %v2044_v52  ;;  %v2320_v52 = vpack.c.bf16 %v245_v47, %v241_v45  ;;  %v2338_v45 = vpack.c.bf16 %v286_v38, %v282_v37  ;;  %v288_v47 = vld [vmem:[%s4865_s23 + $0x748] sm:$0xff]  ;;  %v314_v23 = vld [vmem:[%s4865_s23 + $0x818] sm:$0xff] }
  0x56   :  { %2301 = vmatpush1.bf16.msra.mxu1 %v2300_v53  ;;  %2047 = vmatprep.subr.bf16.mxu0 %v2046_v54  ;;  %v2066_v53 = vpack.c.bf16 %v252_v48, %v248_v25  ;;  %v247_v54 = vld [vmem:[%s4865_s23 + $0x600] sm:$0xff]  ;;  %v292_v25 = vld [vmem:[%s4865_s23 + $0x768] sm:$0xff]  ;;  %v290_v48 = vld [vmem:[%s4865_s23 + $0x758] sm:$0xff] }
  0x57   :  { %2303 = vmatprep.subr.bf16.mxu1 %v2302_v58  ;;  %v253_v58 = vld [vmem:[%s4865_s23 + $0x630] sm:$0xff]  ;;  %v2068_v0 = vpack.c.bf16 %v251_v55, %v247_v54  ;;  %v291_v54 = vld [vmem:[%s4865_s23 + $0x760] sm:$0xff]  ;;  %v318_v26 = vld [vmem:[%s4865_s23 + $0x838] sm:$0xff] }
  0x58   :  { %v289_v55 = vld [vmem:[%s4865_s23 + $0x750] sm:$0xff]  ;;  %v322_v38 = vld [vmem:[%s4865_s23 + $0x858] sm:$0xff] }
  0x59   :  { %2049 = vmatpush1.bf16.msra.mxu0 %v2048_v1  ;;  %v2324_v1 = vpack.c.bf16 %v253_v58, %v249_v56  ;;  %v2342_v56 = vpack.c.bf16 %v294_v49, %v290_v48  ;;  %v296_v58 = vld [vmem:[%s4865_s23 + $0x788] sm:$0xff] }
  0x5a   :  { %2305 = vmatpush1.bf16.msra.mxu1 %v2304_v2  ;;  %2051 = vmatprep.subr.bf16.mxu0 %v2050_v3  ;;  %v2070_v2 = vpack.c.bf16 %v260_v60, %v256_v59  ;;  %v255_v3 = vld [vmem:[%s4865_s23 + $0x640] sm:$0xff]  ;;  %v300_v59 = vld [vmem:[%s4865_s23 + $0x7a8] sm:$0xff]  ;;  %v298_v60 = vld [vmem:[%s4865_s23 + $0x798] sm:$0xff] }
  0x5b   :  { %2307 = vmatprep.subr.bf16.mxu1 %v2306_v7  ;;  %v261_v7 = vld [vmem:[%s4865_s23 + $0x670] sm:$0xff]  ;;  %v2072_v13 = vpack.c.bf16 %v259_v4, %v255_v3  ;;  %v299_v3 = vld [vmem:[%s4865_s23 + $0x7a0] sm:$0xff]  ;;  %v332_v48 = vld [vmem:[%s4865_s23 + $0x8a8] sm:$0xff] }
  0x5c   :  { %v297_v4 = vld [vmem:[%s4865_s23 + $0x790] sm:$0xff] }
  0x5d   :  { %2053 = vmatpush1.bf16.msra.mxu0 %v2052_v14  ;;  %v2328_v14 = vpack.c.bf16 %v261_v7, %v257_v5  ;;  %v2346_v5 = vpack.c.bf16 %v302_v62, %v298_v60  ;;  %v304_v7 = vld [vmem:[%s4865_s23 + $0x7c8] sm:$0xff]  ;;  %v338_v62 = vld [vmem:[%s4865_s23 + $0x8d8] sm:$0xff] }
  0x5e   :  { %2309 = vmatpush1.bf16.msra.mxu1 %v2308_v15  ;;  %2055 = vmatprep.subr.bf16.mxu0 %v2054_v16  ;;  %v2074_v15 = vpack.c.bf16 %v268_v9, %v264_v8  ;;  %v263_v16 = vld [vmem:[%s4865_s23 + $0x680] sm:$0xff]  ;;  %v308_v8 = vld [vmem:[%s4865_s23 + $0x7e8] sm:$0xff]  ;;  %v306_v9 = vld [vmem:[%s4865_s23 + $0x7d8] sm:$0xff] }
  0x5f   :  { %2311 = vmatprep.subr.bf16.mxu1 %v2310_v20  ;;  %v269_v20 = vld [vmem:[%s4865_s23 + $0x6b0] sm:$0xff]  ;;  %v2076_v27 = vpack.c.bf16 %v267_v17, %v263_v16  ;;  %v307_v16 = vld [vmem:[%s4865_s23 + $0x7e0] sm:$0xff]  ;;  %v340_v60 = vld [vmem:[%s4865_s23 + $0x8e8] sm:$0xff] }
  0x60   :  { %v305_v17 = vld [vmem:[%s4865_s23 + $0x7d0] sm:$0xff] }
  0x61   :  { %2057 = vmatpush1.bf16.msra.mxu0 %v2056_v28  ;;  %v2332_v28 = vpack.c.bf16 %v269_v20, %v265_v18  ;;  %v2350_v18 = vpack.c.bf16 %v310_v10, %v306_v9  ;;  %v312_v20 = vld [vmem:[%s4865_s23 + $0x808] sm:$0xff]  ;;  %v346_v10 = vld [vmem:[%s4865_s23 + $0x918] sm:$0xff] }
  0x62   :  { %2313 = vmatpush1.bf16.msra.mxu1 %v2312_v29  ;;  %2059 = vmatprep.subr.bf16.mxu0 %v2058_v30  ;;  %v2078_v29 = vpack.c.bf16 %v276_v22, %v272_v21  ;;  %v271_v30 = vld [vmem:[%s4865_s23 + $0x6c0] sm:$0xff]  ;;  %v316_v21 = vld [vmem:[%s4865_s23 + $0x828] sm:$0xff] }
  0x63   :  { %2315 = vmatprep.subr.bf16.mxu1 %v2314_v34  ;;  %v277_v34 = vld [vmem:[%s4865_s23 + $0x6f0] sm:$0xff]  ;;  %v2080_v39 = vpack.c.bf16 %v275_v31, %v271_v30  ;;  %v3563_v22 = vld [vmem:[%s4847_s0 + $0x8] sm:$0xff]  ;;  %v311_v30 = vld [vmem:[%s4865_s23 + $0x800] sm:$0xff] }
  0x64   :  { %v315_v31 = vld [vmem:[%s4865_s23 + $0x820] sm:$0xff]  ;;  %v3591_v37 = vrot.slane %v3563_v22, %v3040_v11  ;;  %v348_v9 = vld [vmem:[%s4865_s23 + $0x928] sm:$0xff] }
  0x65   :  { %2061 = vmatpush1.bf16.msra.mxu0 %v2060_v40  ;;  %v2336_v40 = vpack.c.bf16 %v277_v34, %v273_v32  ;;  %v313_v32 = vld [vmem:[%s4865_s23 + $0x810] sm:$0xff] }
  0x66   :  { %2317 = vmatpush1.bf16.msra.mxu1 %v2316_v41  ;;  %2063 = vmatprep.subr.bf16.mxu0 %v2062_v42  ;;  %v2082_v41 = vpack.c.bf16 %v284_v36, %v280_v35  ;;  %v279_v42 = vld [vmem:[%s4865_s23 + $0x700] sm:$0xff]  ;;  %v317_v34 = vld [vmem:[%s4865_s23 + $0x830] sm:$0xff]  ;;  %v320_v35 = vld [vmem:[%s4865_s23 + $0x848] sm:$0xff]  ;;  %v623_v49 = vcombine.high %v3591_v37, %v3591_v37 }
  0x67   :  { %2319 = vmatprep.subr.bf16.mxu1 %v2318_v46  ;;  %v285_v46 = vld [vmem:[%s4865_s23 + $0x730] sm:$0xff]  ;;  %v2084_v50 = vpack.c.bf16 %v283_v43, %v279_v42  ;;  %v324_v36 = vld [vmem:[%s4865_s23 + $0x868] sm:$0xff]  ;;  %v319_v43 = vld [vmem:[%s4865_s23 + $0x840] sm:$0xff] }
  0x68   :  { %v2102_v42 = vpack.c.bf16 %v324_v36, %v320_v35  ;;  %v357_v35 = vld [vmem:[%s4865_s23 + $0x970] sm:$0xff]  ;;  %v360_v36 = vld [vmem:[%s4865_s23 + $0x988] sm:$0xff] }
  0x69   :  { %2065 = vmatpush1.bf16.msra.mxu0 %v2064_v51  ;;  %v2340_v51 = vpack.c.bf16 %v285_v46, %v281_v44  ;;  %v323_v44 = vld [vmem:[%s4865_s23 + $0x860] sm:$0xff] }
  0x6a   :  { %2321 = vmatpush1.bf16.msra.mxu1 %v2320_v52  ;;  %2067 = vmatprep.subr.bf16.mxu0 %v2066_v53  ;;  %v2086_v52 = vpack.c.bf16 %v292_v25, %v288_v47  ;;  %v287_v53 = vld [vmem:[%s4865_s23 + $0x740] sm:$0xff]  ;;  %v325_v47 = vld [vmem:[%s4865_s23 + $0x870] sm:$0xff]  ;;  %v328_v25 = vld [vmem:[%s4865_s23 + $0x888] sm:$0xff] }
  0x6b   :  { %2323 = vmatprep.subr.bf16.mxu1 %v2322_v57  ;;  %v293_v57 = vld [vmem:[%s4865_s23 + $0x770] sm:$0xff]  ;;  %v2088_v63 = vpack.c.bf16 %v291_v54, %v287_v53  ;;  %v2106_v54 = vpack.c.bf16 %v332_v48, %v328_v25  ;;  %v368_v48 = vld [vmem:[%s4865_s23 + $0x9c8] sm:$0xff] }
  0x6c   :  { %v365_v25 = vld [vmem:[%s4865_s23 + $0x9b0] sm:$0xff] }
  0x6d   :  { %2069 = vmatpush1.bf16.msra.mxu0 %v2068_v0  ;;  %v2344_v0 = vpack.c.bf16 %v293_v57, %v289_v55  ;;  %v327_v55 = vld [vmem:[%s4865_s23 + $0x880] sm:$0xff]  ;;  %v329_v57 = vld [vmem:[%s4865_s23 + $0x890] sm:$0xff] }
  0x6e   :  { %2325 = vmatpush1.bf16.msra.mxu1 %v2324_v1  ;;  %2071 = vmatprep.subr.bf16.mxu0 %v2070_v2  ;;  %v2090_v1 = vpack.c.bf16 %v300_v59, %v296_v58  ;;  %v295_v2 = vld [vmem:[%s4865_s23 + $0x780] sm:$0xff]  ;;  %v336_v59 = vld [vmem:[%s4865_s23 + $0x8c8] sm:$0xff] }
  0x6f   :  { %2327 = vmatprep.subr.bf16.mxu1 %v2326_v6  ;;  %v301_v6 = vld [vmem:[%s4865_s23 + $0x7b0] sm:$0xff]  ;;  %v2092_v12 = vpack.c.bf16 %v299_v3, %v295_v2  ;;  %v2110_v2 = vpack.c.bf16 %v340_v60, %v336_v59  ;;  %v335_v3 = vld [vmem:[%s4865_s23 + $0x8c0] sm:$0xff]  ;;  %v376_v59 = vld [vmem:[%s4865_s23 + $0xa08] sm:$0xff] }
  0x70   :  { %v380_v60 = vld [vmem:[%s4865_s23 + $0xa28] sm:$0xff] }
  0x71   :  { %2073 = vmatpush1.bf16.msra.mxu0 %v2072_v13  ;;  %v2348_v13 = vpack.c.bf16 %v301_v6, %v297_v4  ;;  %v339_v4 = vld [vmem:[%s4865_s23 + $0x8e0] sm:$0xff] }
  0x72   :  { %2329 = vmatpush1.bf16.msra.mxu1 %v2328_v14  ;;  %2075 = vmatprep.subr.bf16.mxu0 %v2074_v15  ;;  %v2094_v14 = vpack.c.bf16 %v308_v8, %v304_v7  ;;  %v303_v15 = vld [vmem:[%s4865_s23 + $0x7c0] sm:$0xff]  ;;  %v341_v7 = vld [vmem:[%s4865_s23 + $0x8f0] sm:$0xff]  ;;  %v344_v8 = vld [vmem:[%s4865_s23 + $0x908] sm:$0xff] }
  0x73   :  { %2331 = vmatprep.subr.bf16.mxu1 %v2330_v19  ;;  %v309_v19 = vld [vmem:[%s4865_s23 + $0x7f0] sm:$0xff] }
  0x75   :  { %2077 = vmatpush1.bf16.msra.mxu0 %v2076_v27  ;;  %v2096_v27 = vpack.c.bf16 %v307_v16, %v303_v15  ;;  %v2114_v15 = vpack.c.bf16 %v348_v9, %v344_v8  ;;  %v343_v16 = vld [vmem:[%s4865_s23 + $0x900] sm:$0xff]  ;;  %v384_v8 = vld [vmem:[%s4865_s23 + $0xa48] sm:$0xff] }
  0x76   :  { %2333 = vmatpush1.bf16.msra.mxu1 %v2332_v28  ;;  %2079 = vmatprep.subr.bf16.mxu0 %v2078_v29  ;;  %v2352_v28 = vpack.c.bf16 %v309_v19, %v305_v17  ;;  %v2098_v29 = vpack.c.bf16 %v316_v21, %v312_v20  ;;  %v347_v17 = vld [vmem:[%s4865_s23 + $0x920] sm:$0xff]  ;;  %v349_v20 = vld [vmem:[%s4865_s23 + $0x930] sm:$0xff]  ;;  %v352_v21 = vld [vmem:[%s4865_s23 + $0x948] sm:$0xff] }
  0x77   :  { %2335 = vmatprep.subr.bf16.mxu1 %v2334_v33  ;;  %v2354_v33 = vpack.c.bf16 %v318_v26, %v314_v23  ;;  %v356_v23 = vld [vmem:[%s4865_s23 + $0x968] sm:$0xff]  ;;  %v354_v26 = vld [vmem:[%s4865_s23 + $0x958] sm:$0xff] }
  0x78   :  { %v388_v9 = vld [vmem:[%s4865_s23 + $0xa68] sm:$0xff] }
  0x79   :  { %2081 = vmatpush1.bf16.msra.mxu0 %v2080_v39  ;;  %v326_v39 = vld [vmem:[%s4865_s23 + $0x878] sm:$0xff] }
  0x7a   :  { %2337 = vmatpush1.bf16.msra.mxu1 %v2336_v40  ;;  %2083 = vmatprep.subr.bf16.mxu0 %v2082_v41  ;;  %v2100_v40 = vpack.c.bf16 %v315_v31, %v311_v30  ;;  %v2356_v41 = vpack.c.bf16 %v317_v34, %v313_v32  ;;  %v2358_v46 = vpack.c.bf16 %v326_v39, %v322_v38  ;;  %v351_v31 = vld [vmem:[%s4865_s23 + $0x940] sm:$0xff]  ;;  %v364_v38 = vld [vmem:[%s4865_s23 + $0x9a8] sm:$0xff]  ;;  %v362_v39 = vld [vmem:[%s4865_s23 + $0x998] sm:$0xff] }
  0x7b   :  { %2339 = vmatprep.subr.bf16.mxu1 %v2338_v45  ;;  %v321_v45 = vld [vmem:[%s4865_s23 + $0x850] sm:$0xff]  ;;  %v2118_v30 = vpack.c.bf16 %v356_v23, %v352_v21  ;;  %v355_v32 = vld [vmem:[%s4865_s23 + $0x960] sm:$0xff]  ;;  %v392_v21 = vld [vmem:[%s4865_s23 + $0xa88] sm:$0xff] }
  0x7c   :  { %v2360_v53 = vpack.c.bf16 %v325_v47, %v321_v45  ;;  %v363_v45 = vld [vmem:[%s4865_s23 + $0x9a0] sm:$0xff]  ;;  %v396_v23 = vld [vmem:[%s4865_s23 + $0xaa8] sm:$0xff] }
  0x7d   :  { %2085 = vmatpush1.bf16.msra.mxu0 %v2084_v50  ;;  %v330_v50 = vld [vmem:[%s4865_s23 + $0x898] sm:$0xff] }
  0x7e   :  { %2341 = vmatpush1.bf16.msra.mxu1 %v2340_v51  ;;  %2087 = vmatprep.subr.bf16.mxu0 %v2086_v52  ;;  %v334_v51 = vld [vmem:[%s4865_s23 + $0x8b8] sm:$0xff]  ;;  %v2104_v52 = vpack.c.bf16 %v323_v44, %v319_v43  ;;  %v2122_v43 = vpack.c.bf16 %v364_v38, %v360_v36  ;;  %v359_v44 = vld [vmem:[%s4865_s23 + $0x980] sm:$0xff]  ;;  %v400_v36 = vld [vmem:[%s4865_s23 + $0xac8] sm:$0xff] }
  0x7f   :  { %2343 = vmatprep.subr.bf16.mxu1 %v2342_v56  ;;  %v331_v56 = vld [vmem:[%s4865_s23 + $0x8a0] sm:$0xff]  ;;  %v2362_v58 = vpack.c.bf16 %v334_v51, %v330_v50  ;;  %v370_v50 = vld [vmem:[%s4865_s23 + $0x9d8] sm:$0xff]  ;;  %v404_v38 = vld [vmem:[%s4865_s23 + $0xae8] sm:$0xff] }
  0x80   :  { %v374_v51 = vld [vmem:[%s4865_s23 + $0x9f8] sm:$0xff] }
  0x81   :  { %2089 = vmatpush1.bf16.msra.mxu0 %v2088_v63  ;;  %v342_v63 = vld [vmem:[%s4865_s23 + $0x8f8] sm:$0xff] }
  0x82   :  { %2345 = vmatpush1.bf16.msra.mxu1 %v2344_v0  ;;  %2091 = vmatprep.subr.bf16.mxu0 %v2090_v1  ;;  %v2108_v0 = vpack.c.bf16 %v331_v56, %v327_v55  ;;  %v2366_v6 = vpack.c.bf16 %v342_v63, %v338_v62  ;;  %v367_v55 = vld [vmem:[%s4865_s23 + $0x9c0] sm:$0xff]  ;;  %v378_v62 = vld [vmem:[%s4865_s23 + $0xa18] sm:$0xff] }
  0x83   :  { %2347 = vmatprep.subr.bf16.mxu1 %v2346_v5  ;;  %v337_v5 = vld [vmem:[%s4865_s23 + $0x8d0] sm:$0xff]  ;;  %v371_v56 = vld [vmem:[%s4865_s23 + $0x9e0] sm:$0xff]  ;;  %v382_v63 = vld [vmem:[%s4865_s23 + $0xa38] sm:$0xff] }
  0x85   :  { %2093 = vmatpush1.bf16.msra.mxu0 %v2092_v12  ;;  %v350_v12 = vld [vmem:[%s4865_s23 + $0x938] sm:$0xff] }
  0x86   :  { %2349 = vmatpush1.bf16.msra.mxu1 %v2348_v13  ;;  %2095 = vmatprep.subr.bf16.mxu0 %v2094_v14  ;;  %v2112_v13 = vpack.c.bf16 %v339_v4, %v335_v3  ;;  %v2368_v14 = vpack.c.bf16 %v341_v7, %v337_v5  ;;  %v2370_v19 = vpack.c.bf16 %v350_v12, %v346_v10  ;;  %v375_v3 = vld [vmem:[%s4865_s23 + $0xa00] sm:$0xff]  ;;  %v377_v5 = vld [vmem:[%s4865_s23 + $0xa10] sm:$0xff]  ;;  %v386_v10 = vld [vmem:[%s4865_s23 + $0xa58] sm:$0xff] }
  0x87   :  { %2351 = vmatprep.subr.bf16.mxu1 %v2350_v18  ;;  %v345_v18 = vld [vmem:[%s4865_s23 + $0x910] sm:$0xff]  ;;  %v379_v4 = vld [vmem:[%s4865_s23 + $0xa20] sm:$0xff]  ;;  %v390_v12 = vld [vmem:[%s4865_s23 + $0xa78] sm:$0xff] }
  0x88   :  { %v381_v7 = vld [vmem:[%s4865_s23 + $0xa30] sm:$0xff] }
  0x89   :  { %2097 = vmatpush1.bf16.msra.mxu0 %v2096_v27  ;;  %v358_v27 = vld [vmem:[%s4865_s23 + $0x978] sm:$0xff] }
  0x8a   :  { %2353 = vmatpush1.bf16.msra.mxu1 %v2352_v28  ;;  %2099 = vmatprep.subr.bf16.mxu0 %v2098_v29  ;;  %v2116_v28 = vpack.c.bf16 %v347_v17, %v343_v16  ;;  %v2372_v29 = vpack.c.bf16 %v349_v20, %v345_v18  ;;  %v2374_v34 = vpack.c.bf16 %v358_v27, %v354_v26  ;;  %v383_v16 = vld [vmem:[%s4865_s23 + $0xa40] sm:$0xff]  ;;  %v385_v18 = vld [vmem:[%s4865_s23 + $0xa50] sm:$0xff]  ;;  %v394_v26 = vld [vmem:[%s4865_s23 + $0xa98] sm:$0xff] }
  0x8b   :  { %2355 = vmatprep.subr.bf16.mxu1 %v2354_v33  ;;  %v353_v33 = vld [vmem:[%s4865_s23 + $0x950] sm:$0xff]  ;;  %v387_v17 = vld [vmem:[%s4865_s23 + $0xa60] sm:$0xff]  ;;  %v398_v27 = vld [vmem:[%s4865_s23 + $0xab8] sm:$0xff] }
  0x8c   :  { %769 = vmatmul.mubr.f32.vlgmr.msra.gmra.mrb[0].mxu0 %v3194_v24  ;;  %v389_v20 = vld [vmem:[%s4865_s23 + $0xa70] sm:$0xff] }
  0x8d   :  { %2101 = vmatpush1.bf16.msra.mxu0 %v2100_v40  ;;  %1053 = vmatmul.mubr.f32.vlgmr.msra.gmra.mrb[0].mxu1 %v3194_v24  ;;  %v333_v24 = vld [vmem:[%s4865_s23 + $0x8b0] sm:$0xff]  ;;  %v366_v40 = vld [vmem:[%s4865_s23 + $0x9b8] sm:$0xff] }
  0x8e   :  { %2357 = vmatpush1.bf16.msra.mxu1 %v2356_v41  ;;  %2103 = vmatprep.subr.bf16.mxu0 %v2102_v42  ;;  %v2364_v1 = vpack.c.bf16 %v333_v24, %v329_v57  ;;  %v2120_v41 = vpack.c.bf16 %v355_v32, %v351_v31  ;;  %v2376_v42 = vpack.c.bf16 %v357_v35, %v353_v33  ;;  %v369_v57 = vld [vmem:[%s4865_s23 + $0x9d0] sm:$0xff]  ;;  %v391_v31 = vld [vmem:[%s4865_s23 + $0xa80] sm:$0xff] }
  0x8f   :  { %2359 = vmatprep.subr.bf16.mxu1 %v2358_v46  ;;  %839 = vmatprep.mubr.f32.mxu0 %v623_v49  ;;  %v361_v46 = vld [vmem:[%s4865_s23 + $0x990] sm:$0xff]  ;;  %v2378_v47 = vpack.c.bf16 %v366_v40, %v362_v39  ;;  %v395_v32 = vld [vmem:[%s4865_s23 + $0xaa0] sm:$0xff]  ;;  %v402_v39 = vld [vmem:[%s4865_s23 + $0xad8] sm:$0xff] }
  0x90   :  { %1123 = vmatprep.mubr.f32.mxu1 %v623_v49  ;;  %v372_v49 = vld [vmem:[%s4865_s23 + $0x9e8] sm:$0xff]  ;;  %v373_v24 = vld [vmem:[%s4865_s23 + $0x9f0] sm:$0xff]  ;;  %v406_v40 = vld [vmem:[%s4865_s23 + $0xaf8] sm:$0xff] }
  0x91   :  { %2105 = vmatpush1.bf16.msra.mxu0 %v2104_v52  ;;  %v2124_v52 = vpack.c.bf16 %v363_v45, %v359_v44  ;;  %v393_v33 = vld [vmem:[%s4865_s23 + $0xa90] sm:$0xff]  ;;  %v399_v44 = vld [vmem:[%s4865_s23 + $0xac0] sm:$0xff] }
  0x92   :  { %2361 = vmatpush1.bf16.msra.mxu1 %v2360_v53  ;;  %2107 = vmatprep.subr.bf16.mxu0 %v2106_v54  ;;  %v2380_v53 = vpack.c.bf16 %v365_v25, %v361_v46  ;;  %v2126_v54 = vpack.c.bf16 %v372_v49, %v368_v48  ;;  %v397_v35 = vld [vmem:[%s4865_s23 + $0xab0] sm:$0xff]  ;;  %v403_v45 = vld [vmem:[%s4865_s23 + $0xae0] sm:$0xff]  ;;  %v408_v48 = vld [vmem:[%s4865_s23 + $0xb08] sm:$0xff] }
  0x93   :  { %2363 = vmatprep.subr.bf16.mxu1 %v2362_v58  ;;  %v2382_v58 = vpack.c.bf16 %v374_v51, %v370_v50  ;;  %v401_v46 = vld [vmem:[%s4865_s23 + $0xad0] sm:$0xff]  ;;  %v412_v49 = vld [vmem:[%s4865_s23 + $0xb28] sm:$0xff]  ;;  %v410_v50 = vld [vmem:[%s4865_s23 + $0xb18] sm:$0xff] }
  0x94   :  { %v405_v25 = vld [vmem:[%s4865_s23 + $0xaf0] sm:$0xff]  ;;  %v414_v51 = vld [vmem:[%s4865_s23 + $0xb38] sm:$0xff] }
  0x95   :  { %2109 = vmatpush1.bf16.msra.mxu0 %v2108_v0  ;;  %v2128_v0 = vpack.c.bf16 %v371_v56, %v367_v55  ;;  %v407_v55 = vld [vmem:[%s4865_s23 + $0xb00] sm:$0xff] }
  0x96   :  { %2365 = vmatpush1.bf16.msra.mxu1 %v2364_v1  ;;  %2111 = vmatprep.subr.bf16.mxu0 %v2110_v2  ;;  %v2384_v1 = vpack.c.bf16 %v373_v24, %v369_v57  ;;  %v2130_v2 = vpack.c.bf16 %v380_v60, %v376_v59  ;;  %v411_v56 = vld [vmem:[%s4865_s23 + $0xb20] sm:$0xff]  ;;  %v409_v57 = vld [vmem:[%s4865_s23 + $0xb10] sm:$0xff]  ;;  %v416_v59 = vld [vmem:[%s4865_s23 + $0xb48] sm:$0xff] }
  0x97   :  { %2367 = vmatprep.subr.bf16.mxu1 %v2366_v6  ;;  %v2386_v6 = vpack.c.bf16 %v382_v63, %v378_v62  ;;  %v413_v24 = vld [vmem:[%s4865_s23 + $0xb30] sm:$0xff]  ;;  %v420_v60 = vld [vmem:[%s4865_s23 + $0xb68] sm:$0xff]  ;;  %v418_v62 = vld [vmem:[%s4865_s23 + $0xb58] sm:$0xff] }
  0x98   :  { %v422_v63 = vld [vmem:[%s4865_s23 + $0xb78] sm:$0xff] }
  0x99   :  { %2113 = vmatpush1.bf16.msra.mxu0 %v2112_v13  ;;  %v2132_v13 = vpack.c.bf16 %v379_v4, %v375_v3  ;;  %v415_v3 = vld [vmem:[%s4865_s23 + $0xb40] sm:$0xff] }
  0x9a   :  { %2369 = vmatpush1.bf16.msra.mxu1 %v2368_v14  ;;  %2115 = vmatprep.subr.bf16.mxu0 %v2114_v15  ;;  %v2388_v14 = vpack.c.bf16 %v381_v7, %v377_v5  ;;  %v2134_v15 = vpack.c.bf16 %v388_v9, %v384_v8  ;;  %v419_v4 = vld [vmem:[%s4865_s23 + $0xb60] sm:$0xff]  ;;  %v417_v5 = vld [vmem:[%s4865_s23 + $0xb50] sm:$0xff]  ;;  %v424_v8 = vld [vmem:[%s4865_s23 + $0xb88] sm:$0xff] }
  0x9b   :  { %2371 = vmatprep.subr.bf16.mxu1 %v2370_v19  ;;  %v2390_v19 = vpack.c.bf16 %v390_v12, %v386_v10  ;;  %v421_v7 = vld [vmem:[%s4865_s23 + $0xb70] sm:$0xff]  ;;  %v428_v9 = vld [vmem:[%s4865_s23 + $0xba8] sm:$0xff]  ;;  %v426_v10 = vld [vmem:[%s4865_s23 + $0xb98] sm:$0xff] }
  0x9c   :  { %v430_v12 = vld [vmem:[%s4865_s23 + $0xbb8] sm:$0xff] }
  0x9d   :  { %2117 = vmatpush1.bf16.msra.mxu0 %v2116_v28  ;;  %v2136_v28 = vpack.c.bf16 %v387_v17, %v383_v16  ;;  %v423_v16 = vld [vmem:[%s4865_s23 + $0xb80] sm:$0xff] }
  0x9e   :  { %2373 = vmatpush1.bf16.msra.mxu1 %v2372_v29  ;;  %2119 = vmatprep.subr.bf16.mxu0 %v2118_v30  ;;  %v2392_v29 = vpack.c.bf16 %v389_v20, %v385_v18  ;;  %v2138_v30 = vpack.c.bf16 %v396_v23, %v392_v21  ;;  %v427_v17 = vld [vmem:[%s4865_s23 + $0xba0] sm:$0xff]  ;;  %v425_v18 = vld [vmem:[%s4865_s23 + $0xb90] sm:$0xff]  ;;  %v432_v21 = vld [vmem:[%s4865_s23 + $0xbc8] sm:$0xff] }
  0x9f   :  { %2375 = vmatprep.subr.bf16.mxu1 %v2374_v34  ;;  %v2394_v34 = vpack.c.bf16 %v398_v27, %v394_v26  ;;  %v429_v20 = vld [vmem:[%s4865_s23 + $0xbb0] sm:$0xff]  ;;  %v436_v23 = vld [vmem:[%s4865_s23 + $0xbe8] sm:$0xff]  ;;  %v434_v26 = vld [vmem:[%s4865_s23 + $0xbd8] sm:$0xff] }
  0xa0   :  { %v438_v27 = vld [vmem:[%s4865_s23 + $0xbf8] sm:$0xff] }
  0xa1   :  { %2121 = vmatpush1.bf16.msra.mxu0 %v2120_v41  ;;  %v2140_v41 = vpack.c.bf16 %v395_v32, %v391_v31  ;;  %v431_v31 = vld [vmem:[%s4865_s23 + $0xbc0] sm:$0xff] }
  0xa2   :  { %2377 = vmatpush1.bf16.msra.mxu1 %v2376_v42  ;;  %2123 = vmatprep.subr.bf16.mxu0 %v2122_v43  ;;  %v2396_v42 = vpack.c.bf16 %v397_v35, %v393_v33  ;;  %v2142_v43 = vpack.c.bf16 %v404_v38, %v400_v36  ;;  %v435_v32 = vld [vmem:[%s4865_s23 + $0xbe0] sm:$0xff]  ;;  %v433_v33 = vld [vmem:[%s4865_s23 + $0xbd0] sm:$0xff]  ;;  %v2414_v35 = vpack.c.bf16 %v438_v27, %v434_v26  ;;  %v440_v38 = vld [vmem:[%s4865_s23 + $0xc08] sm:$0xff] }
  0xa3   :  { %2379 = vmatprep.subr.bf16.mxu1 %v2378_v47  ;;  %v2398_v47 = vpack.c.bf16 %v406_v40, %v402_v39  ;;  %v437_v36 = vld [vmem:[%s4865_s23 + $0xbf0] sm:$0xff]  ;;  %v444_v39 = vld [vmem:[%s4865_s23 + $0xc28] sm:$0xff]  ;;  %v442_v40 = vld [vmem:[%s4865_s23 + $0xc18] sm:$0xff] }
  0xa4   :  { %v474_v26 = vld [vmem:[%s4865_s23 + $0xd18] sm:$0xff] }
  0xa5   :  { %2125 = vmatpush1.bf16.msra.mxu0 %v2124_v52  ;;  %v2144_v52 = vpack.c.bf16 %v403_v45, %v399_v44  ;;  %v439_v44 = vld [vmem:[%s4865_s23 + $0xc00] sm:$0xff]  ;;  %v478_v27 = vld [vmem:[%s4865_s23 + $0xd38] sm:$0xff] }
  0xa6   :  { %2381 = vmatpush1.bf16.msra.mxu1 %v2380_v53  ;;  %2127 = vmatprep.subr.bf16.mxu0 %v2126_v54  ;;  %v2400_v53 = vpack.c.bf16 %v405_v25, %v401_v46  ;;  %v2146_v54 = vpack.c.bf16 %v412_v49, %v408_v48  ;;  %v443_v45 = vld [vmem:[%s4865_s23 + $0xc20] sm:$0xff]  ;;  %v441_v46 = vld [vmem:[%s4865_s23 + $0xc10] sm:$0xff]  ;;  %v448_v48 = vld [vmem:[%s4865_s23 + $0xc48] sm:$0xff] }
  0xa7   :  { %2383 = vmatprep.subr.bf16.mxu1 %v2382_v58  ;;  %v2402_v58 = vpack.c.bf16 %v414_v51, %v410_v50  ;;  %v445_v25 = vld [vmem:[%s4865_s23 + $0xc30] sm:$0xff]  ;;  %v452_v49 = vld [vmem:[%s4865_s23 + $0xc68] sm:$0xff]  ;;  %v450_v51 = vld [vmem:[%s4865_s23 + $0xc58] sm:$0xff] }
  0xa9   :  { %2129 = vmatpush1.bf16.msra.mxu0 %v2128_v0  ;;  %v2148_v0 = vpack.c.bf16 %v411_v56, %v407_v55  ;;  %v2166_v55 = vpack.c.bf16 %v452_v49, %v448_v48  ;;  %v447_v56 = vld [vmem:[%s4865_s23 + $0xc40] sm:$0xff]  ;;  %v492_v48 = vld [vmem:[%s4865_s23 + $0xda8] sm:$0xff]  ;;  %v490_v49 = vld [vmem:[%s4865_s23 + $0xd98] sm:$0xff] }
  0xaa   :  { %2385 = vmatpush1.bf16.msra.mxu1 %v2384_v1  ;;  %2131 = vmatprep.subr.bf16.mxu0 %v2130_v2  ;;  %v2404_v1 = vpack.c.bf16 %v413_v24, %v409_v57  ;;  %v2150_v2 = vpack.c.bf16 %v420_v60, %v416_v59  ;;  %v449_v57 = vld [vmem:[%s4865_s23 + $0xc50] sm:$0xff]  ;;  %v456_v59 = vld [vmem:[%s4865_s23 + $0xc88] sm:$0xff] }
  0xab   :  { %2387 = vmatprep.subr.bf16.mxu1 %v2386_v6  ;;  %v2406_v6 = vpack.c.bf16 %v422_v63, %v418_v62  ;;  %v453_v24 = vld [vmem:[%s4865_s23 + $0xc70] sm:$0xff]  ;;  %v460_v60 = vld [vmem:[%s4865_s23 + $0xca8] sm:$0xff]  ;;  %v458_v63 = vld [vmem:[%s4865_s23 + $0xc98] sm:$0xff] }
  0xad   :  { %2133 = vmatpush1.bf16.msra.mxu0 %v2132_v13  ;;  %v2152_v13 = vpack.c.bf16 %v419_v4, %v415_v3  ;;  %v2170_v3 = vpack.c.bf16 %v460_v60, %v456_v59  ;;  %v455_v4 = vld [vmem:[%s4865_s23 + $0xc80] sm:$0xff]  ;;  %v500_v59 = vld [vmem:[%s4865_s23 + $0xde8] sm:$0xff]  ;;  %v498_v60 = vld [vmem:[%s4865_s23 + $0xdd8] sm:$0xff] }
  0xae   :  { %2389 = vmatpush1.bf16.msra.mxu1 %v2388_v14  ;;  %2135 = vmatprep.subr.bf16.mxu0 %v2134_v15  ;;  %v2408_v14 = vpack.c.bf16 %v421_v7, %v417_v5  ;;  %v2154_v15 = vpack.c.bf16 %v428_v9, %v424_v8  ;;  %v459_v5 = vld [vmem:[%s4865_s23 + $0xca0] sm:$0xff]  ;;  %v464_v8 = vld [vmem:[%s4865_s23 + $0xcc8] sm:$0xff] }
  0xaf   :  { %2391 = vmatprep.subr.bf16.mxu1 %v2390_v19  ;;  %v2410_v19 = vpack.c.bf16 %v430_v12, %v426_v10  ;;  %v468_v9 = vld [vmem:[%s4865_s23 + $0xce8] sm:$0xff]  ;;  %v466_v10 = vld [vmem:[%s4865_s23 + $0xcd8] sm:$0xff] }
  0xb0   :  { %v470_v12 = vld [vmem:[%s4865_s23 + $0xcf8] sm:$0xff] }
  0xb1   :  { %2137 = vmatpush1.bf16.msra.mxu0 %v2136_v28  ;;  %v2156_v28 = vpack.c.bf16 %v427_v17, %v423_v16  ;;  %v463_v16 = vld [vmem:[%s4865_s23 + $0xcc0] sm:$0xff] }
  0xb2   :  { %2393 = vmatpush1.bf16.msra.mxu1 %v2392_v29  ;;  %2139 = vmatprep.subr.bf16.mxu0 %v2138_v30  ;;  %v2412_v29 = vpack.c.bf16 %v429_v20, %v425_v18  ;;  %v2158_v30 = vpack.c.bf16 %v436_v23, %v432_v21  ;;  %v467_v17 = vld [vmem:[%s4865_s23 + $0xce0] sm:$0xff]  ;;  %v465_v18 = vld [vmem:[%s4865_s23 + $0xcd0] sm:$0xff]  ;;  %v472_v21 = vld [vmem:[%s4865_s23 + $0xd08] sm:$0xff] }
  0xb3   :  { %2395 = vmatprep.subr.bf16.mxu1 %v2394_v34  ;;  %v608_v34 = vcombine.high %v3563_v22, %v3563_v22  ;;  %v446_v22 = vld [vmem:[%s4865_s23 + $0xc38] sm:$0xff]  ;;  %v469_v20 = vld [vmem:[%s4865_s23 + $0xcf0] sm:$0xff]  ;;  %v476_v23 = vld [vmem:[%s4865_s23 + $0xd28] sm:$0xff] }
  0xb5   :  { %2141 = vmatpush1.bf16.msra.mxu0 %v2140_v41  ;;  %v2160_v41 = vpack.c.bf16 %v435_v32, %v431_v31  ;;  %v3984_v50 = vrot.slane %v608_v34, %v3040_v11  ;;  %v451_v11 = vld [vmem:[%s4865_s23 + $0xc60] sm:$0xff]  ;;  %v2434_v34 = vpack.c.bf16 %v478_v27, %v474_v26 }
  0xb6   :  { %2397 = vmatpush1.bf16.msra.mxu1 %v2396_v42  ;;  %2143 = vmatprep.subr.bf16.mxu0 %v2142_v43  ;;  %v2416_v42 = vpack.c.bf16 %v437_v36, %v433_v33  ;;  %v2162_v43 = vpack.c.bf16 %v444_v39, %v440_v38  ;;  %v471_v31 = vld [vmem:[%s4865_s23 + $0xd00] sm:$0xff]  ;;  %v473_v33 = vld [vmem:[%s4865_s23 + $0xd10] sm:$0xff]  ;;  %v480_v36 = vld [vmem:[%s4865_s23 + $0xd48] sm:$0xff] }
  0xb7   :  { %2399 = vmatprep.subr.bf16.mxu1 %v2398_v47  ;;  %v2418_v47 = vpack.c.bf16 %v446_v22, %v442_v40  ;;  %v624_v62 = vcombine.high %v3984_v50, %v3984_v50  ;;  %v475_v32 = vld [vmem:[%s4865_s23 + $0xd20] sm:$0xff]  ;;  %v484_v38 = vld [vmem:[%s4865_s23 + $0xd68] sm:$0xff]  ;;  %v482_v39 = vld [vmem:[%s4865_s23 + $0xd58] sm:$0xff] }
  0xb8   :  { %v486_v40 = vld [vmem:[%s4865_s23 + $0xd78] sm:$0xff]  ;;  %v2180_v22 = vpack.c.bf16 %v475_v32, %v471_v31  ;;  %v513_v31 = vld [vmem:[%s4865_s23 + $0xe50] sm:$0xff] }
  0xb9   :  { %2145 = vmatpush1.bf16.msra.mxu0 %v2144_v52  ;;  %v454_v52 = vld [vmem:[%s4865_s23 + $0xc78] sm:$0xff] }
  0xba   :  { %2401 = vmatpush1.bf16.msra.mxu1 %v2400_v53  ;;  %2147 = vmatprep.subr.bf16.mxu0 %v2146_v54  ;;  %v2164_v53 = vpack.c.bf16 %v443_v45, %v439_v44  ;;  %v2420_v54 = vpack.c.bf16 %v445_v25, %v441_v46  ;;  %v483_v44 = vld [vmem:[%s4865_s23 + $0xd60] sm:$0xff]  ;;  %v481_v45 = vld [vmem:[%s4865_s23 + $0xd50] sm:$0xff]  ;;  %v2438_v46 = vpack.c.bf16 %v486_v40, %v482_v39  ;;  %v488_v25 = vld [vmem:[%s4865_s23 + $0xd88] sm:$0xff] }
  0xbb   :  { %2403 = vmatprep.subr.bf16.mxu1 %v2402_v58  ;;  %v2422_v58 = vpack.c.bf16 %v454_v52, %v450_v51  ;;  %v494_v51 = vld [vmem:[%s4865_s23 + $0xdb8] sm:$0xff] }
  0xbd   :  { %2149 = vmatpush1.bf16.msra.mxu0 %v2148_v0  ;;  %v462_v0 = vld [vmem:[%s4865_s23 + $0xcb8] sm:$0xff] }
  0xbe   :  { %2405 = vmatpush1.bf16.msra.mxu1 %v2404_v1  ;;  %2151 = vmatprep.subr.bf16.mxu0 %v2150_v2  ;;  %v2168_v1 = vpack.c.bf16 %v451_v11, %v447_v56  ;;  %v2424_v2 = vpack.c.bf16 %v453_v24, %v449_v57  ;;  %v2426_v7 = vpack.c.bf16 %v462_v0, %v458_v63  ;;  %v491_v56 = vld [vmem:[%s4865_s23 + $0xda0] sm:$0xff]  ;;  %v489_v11 = vld [vmem:[%s4865_s23 + $0xd90] sm:$0xff]  ;;  %v496_v24 = vld [vmem:[%s4865_s23 + $0xdc8] sm:$0xff] }
  0xbf   :  { %2407 = vmatprep.subr.bf16.mxu1 %v2406_v6  ;;  %v457_v6 = vld [vmem:[%s4865_s23 + $0xc90] sm:$0xff]  ;;  %v2442_v57 = vpack.c.bf16 %v494_v51, %v490_v49 }
  0xc1   :  { %2153 = vmatpush1.bf16.msra.mxu0 %v2152_v13  ;;  %v2172_v13 = vpack.c.bf16 %v459_v5, %v455_v4  ;;  %v497_v4 = vld [vmem:[%s4865_s23 + $0xdd0] sm:$0xff] }
  0xc2   :  { %2409 = vmatpush1.bf16.msra.mxu1 %v2408_v14  ;;  %2155 = vmatprep.subr.bf16.mxu0 %v2154_v15  ;;  %v2174_v15 = vpack.c.bf16 %v468_v9, %v464_v8  ;;  %v506_v8 = vld [vmem:[%s4865_s23 + $0xe18] sm:$0xff] }
  0xc3   :  { %2411 = vmatprep.subr.bf16.mxu1 %v2410_v19  ;;  %v2430_v19 = vpack.c.bf16 %v470_v12, %v466_v10  ;;  %v510_v9 = vld [vmem:[%s4865_s23 + $0xe38] sm:$0xff] }
  0xc5   :  { %2157 = vmatpush1.bf16.msra.mxu0 %v2156_v28  ;;  %v2176_v28 = vpack.c.bf16 %v467_v17, %v463_v16  ;;  %v505_v16 = vld [vmem:[%s4865_s23 + $0xe10] sm:$0xff]  ;;  %v2450_v17 = vpack.c.bf16 %v510_v9, %v506_v8 }
  0xc6   :  { %2413 = vmatpush1.bf16.msra.mxu1 %v2412_v29  ;;  %2159 = vmatprep.subr.bf16.mxu0 %v2158_v30  ;;  %v2432_v29 = vpack.c.bf16 %v469_v20, %v465_v18  ;;  %v2178_v30 = vpack.c.bf16 %v476_v23, %v472_v21  ;;  %v509_v18 = vld [vmem:[%s4865_s23 + $0xe30] sm:$0xff]  ;;  %v516_v20 = vld [vmem:[%s4865_s23 + $0xe68] sm:$0xff]  ;;  %v514_v21 = vld [vmem:[%s4865_s23 + $0xe58] sm:$0xff] }
  0xc7   :  { %2415 = vmatprep.subr.bf16.mxu1 %v2414_v35  ;;  %v477_v35 = vld [vmem:[%s4865_s23 + $0xd30] sm:$0xff]  ;;  %v518_v23 = vld [vmem:[%s4865_s23 + $0xe78] sm:$0xff]  ;;  %v2452_v27 = vpack.c.bf16 %v509_v18, %v505_v16  ;;  %v556_v18 = vld [vmem:[%s4865_s23 + $0xfa8] sm:$0xff] }
  0xc8   :  { %v2454_v32 = vpack.c.bf16 %v518_v23, %v514_v21  ;;  %v549_v16 = vld [vmem:[%s4865_s23 + $0xf70] sm:$0xff] }
  0xc9   :  { %2161 = vmatpush1.bf16.msra.mxu0 %v2160_v41  ;;  %v2436_v41 = vpack.c.bf16 %v477_v35, %v473_v33  ;;  %v517_v33 = vld [vmem:[%s4865_s23 + $0xe70] sm:$0xff]  ;;  %v524_v35 = vld [vmem:[%s4865_s23 + $0xea8] sm:$0xff] }
  0xca   :  { %2417 = vmatpush1.bf16.msra.mxu1 %v2416_v42  ;;  %2163 = vmatprep.subr.bf16.mxu0 %v2162_v43  ;;  %v2182_v42 = vpack.c.bf16 %v484_v38, %v480_v36  ;;  %v479_v43 = vld [vmem:[%s4865_s23 + $0xd40] sm:$0xff]  ;;  %v522_v36 = vld [vmem:[%s4865_s23 + $0xe98] sm:$0xff]  ;;  %v2456_v40 = vpack.c.bf16 %v517_v33, %v513_v31  ;;  %v557_v31 = vld [vmem:[%s4865_s23 + $0xfb0] sm:$0xff] }
  0xcb   :  { %2419 = vmatprep.subr.bf16.mxu1 %v2418_v47  ;;  %v485_v47 = vld [vmem:[%s4865_s23 + $0xd70] sm:$0xff]  ;;  %v2184_v52 = vpack.c.bf16 %v483_v44, %v479_v43  ;;  %v526_v38 = vld [vmem:[%s4865_s23 + $0xeb8] sm:$0xff]  ;;  %v564_v33 = vld [vmem:[%s4865_s23 + $0xfe8] sm:$0xff] }
  0xcc   :  { %840 = vmatmul.mubr.f32.vlgmr.msra.gmra.mrb[0].mxu0 %v3591_v37  ;;  %v521_v43 = vld [vmem:[%s4865_s23 + $0xe90] sm:$0xff]  ;;  %v2458_v44 = vpack.c.bf16 %v526_v38, %v522_v36 }
  0xcd   :  { %2165 = vmatpush1.bf16.msra.mxu0 %v2164_v53  ;;  %1124 = vmatmul.mubr.f32.vlgmr.msra.gmra.mrb[0].mxu1 %v3591_v37  ;;  %v461_v37 = vld [vmem:[%s4865_s23 + $0xcb0] sm:$0xff]  ;;  %v2440_v53 = vpack.c.bf16 %v485_v47, %v481_v45  ;;  %v532_v47 = vld [vmem:[%s4865_s23 + $0xee8] sm:$0xff] }
  0xce   :  { %2421 = vmatpush1.bf16.msra.mxu1 %v2420_v54  ;;  %2167 = vmatprep.subr.bf16.mxu0 %v2166_v55  ;;  %v2428_v14 = vpack.c.bf16 %v461_v37, %v457_v6  ;;  %v2186_v54 = vpack.c.bf16 %v492_v48, %v488_v25  ;;  %v487_v55 = vld [vmem:[%s4865_s23 + $0xd80] sm:$0xff]  ;;  %v501_v6 = vld [vmem:[%s4865_s23 + $0xdf0] sm:$0xff]  ;;  %v508_v37 = vld [vmem:[%s4865_s23 + $0xe28] sm:$0xff] }
  0xcf   :  { %2423 = vmatprep.subr.bf16.mxu1 %v2422_v58  ;;  %910 = vmatprep.mubr.f32.mxu0 %v624_v62  ;;  %v493_v58 = vld [vmem:[%s4865_s23 + $0xdb0] sm:$0xff]  ;;  %v2188_v63 = vpack.c.bf16 %v491_v56, %v487_v55  ;;  %v2448_v12 = vpack.c.bf16 %v501_v6, %v497_v4  ;;  %v530_v25 = vld [vmem:[%s4865_s23 + $0xed8] sm:$0xff]  ;;  %v548_v6 = vld [vmem:[%s4865_s23 + $0xf68] sm:$0xff] }
  0xd0   :  { %1194 = vmatprep.mubr.f32.mxu1 %v624_v62  ;;  %v502_v62 = vld [vmem:[%s4865_s23 + $0xdf8] sm:$0xff]  ;;  %v2444_v0 = vpack.c.bf16 %v493_v58, %v489_v11  ;;  %v525_v45 = vld [vmem:[%s4865_s23 + $0xeb0] sm:$0xff]  ;;  %v540_v58 = vld [vmem:[%s4865_s23 + $0xf28] sm:$0xff] }
  0xd1   :  { %2169 = vmatpush1.bf16.msra.mxu0 %v2168_v1  ;;  %v2190_v1 = vpack.c.bf16 %v500_v59, %v496_v24  ;;  %v2446_v5 = vpack.c.bf16 %v502_v62, %v498_v60  ;;  %v534_v48 = vld [vmem:[%s4865_s23 + $0xef8] sm:$0xff]  ;;  %v2460_v51 = vpack.c.bf16 %v525_v45, %v521_v43  ;;  %v529_v55 = vld [vmem:[%s4865_s23 + $0xed0] sm:$0xff] }
  0xd2   :  { %2425 = vmatpush1.bf16.msra.mxu1 %v2424_v2  ;;  %2171 = vmatprep.subr.bf16.mxu0 %v2170_v3  ;;  %v495_v2 = vld [vmem:[%s4865_s23 + $0xdc0] sm:$0xff]  ;;  %v2462_v56 = vpack.c.bf16 %v534_v48, %v530_v25  ;;  %v533_v11 = vld [vmem:[%s4865_s23 + $0xef0] sm:$0xff]  ;;  %v538_v24 = vld [vmem:[%s4865_s23 + $0xf18] sm:$0xff] }
  0xd3   :  { %2427 = vmatprep.subr.bf16.mxu1 %v2426_v7  ;;  %v499_v3 = vld [vmem:[%s4865_s23 + $0xde0] sm:$0xff]  ;;  %v504_v7 = vld [vmem:[%s4865_s23 + $0xe08] sm:$0xff]  ;;  %v542_v59 = vld [vmem:[%s4865_s23 + $0xf38] sm:$0xff]  ;;  %v2464_v62 = vpack.c.bf16 %v533_v11, %v529_v55 }
  0xd4   :  { %v2192_v10 = vpack.c.bf16 %v499_v3, %v495_v2  ;;  %v537_v2 = vld [vmem:[%s4865_s23 + $0xf10] sm:$0xff]  ;;  %v2466_v3 = vpack.c.bf16 %v542_v59, %v538_v24  ;;  %v1208_v45 = vld [vmem:[%s4848_s4 + $0x18] sm:$0xff]  ;;  %v1205_v48 = vld [vmem:[%s4848_s4] sm:$0xff] }
  0xd5   :  { %2173 = vmatpush1.bf16.msra.mxu0 %v2172_v13  ;;  %v2194_v13 = vpack.c.bf16 %v508_v37, %v504_v7  ;;  %v541_v4 = vld [vmem:[%s4865_s23 + $0xf30] sm:$0xff]  ;;  %v546_v7 = vld [vmem:[%s4865_s23 + $0xf58] sm:$0xff]  ;;  %v1209_v55 = vld [vmem:[%s4848_s4 + $0x20] sm:$0xff] }
  0xd6   :  { %2429 = vmatpush1.bf16.msra.mxu1 %v2428_v14  ;;  %2175 = vmatprep.subr.bf16.mxu0 %v2174_v15  ;;  %v503_v14 = vld [vmem:[%s4865_s23 + $0xe00] sm:$0xff]  ;;  %v550_v37 = vld [vmem:[%s4865_s23 + $0xf78] sm:$0xff]  ;;  %v2468_v9 = vpack.c.bf16 %v541_v4, %v537_v2  ;;  %v565_v43 = vld [vmem:[%s4865_s23 + $0xff0] sm:$0xff] }
  0xd7   :  { %2431 = vmatprep.subr.bf16.mxu1 %v2430_v19  ;;  %v507_v15 = vld [vmem:[%s4865_s23 + $0xe20] sm:$0xff]  ;;  %v512_v19 = vld [vmem:[%s4865_s23 + $0xe48] sm:$0xff]  ;;  %v1219_v2 = vld [vmem:[%s4848_s4 + $0x70] sm:$0xff] }
  0xd8   :  { %v2196_v26 = vpack.c.bf16 %v507_v15, %v503_v14  ;;  %v545_v14 = vld [vmem:[%s4865_s23 + $0xf50] sm:$0xff]  ;;  %v2470_v15 = vpack.c.bf16 %v550_v37, %v546_v7  ;;  %v1214_v11 = vld [vmem:[%s4848_s4 + $0x48] sm:$0xff]  ;;  %v1213_v59 = vld [vmem:[%s4848_s4 + $0x40] sm:$0xff] }
  0xd9   :  { %2177 = vmatpush1.bf16.msra.mxu0 %v2176_v28  ;;  %v2198_v28 = vpack.c.bf16 %v516_v20, %v512_v19  ;;  %v554_v19 = vld [vmem:[%s4865_s23 + $0xf98] sm:$0xff]  ;;  %v2472_v23 = vpack.c.bf16 %v549_v16, %v545_v14  ;;  %v1221_v7 = vld [vmem:[%s4848_s4 + $0x80] sm:$0xff]  ;;  %v1223_v37 = vld [vmem:[%s4848_s4 + $0x90] sm:$0xff] }
  0xda   :  { %2433 = vmatpush1.bf16.msra.mxu1 %v2432_v29  ;;  %2179 = vmatprep.subr.bf16.mxu0 %v2178_v30  ;;  %v511_v29 = vld [vmem:[%s4865_s23 + $0xe40] sm:$0xff]  ;;  %v558_v20 = vld [vmem:[%s4865_s23 + $0xfb8] sm:$0xff]  ;;  %v1227_v14 = vld [vmem:[%s4848_s4 + $0xb0] sm:$0xff] }
  0xdb   :  { %2435 = vmatprep.subr.bf16.mxu1 %v2434_v34  ;;  %v515_v30 = vld [vmem:[%s4865_s23 + $0xe60] sm:$0xff]  ;;  %v520_v34 = vld [vmem:[%s4865_s23 + $0xe88] sm:$0xff]  ;;  %v1224_v4 = vld [vmem:[%s4848_s4 + $0x98] sm:$0xff] }
  0xdc   :  { %v2200_v39 = vpack.c.bf16 %v515_v30, %v511_v29  ;;  %v553_v29 = vld [vmem:[%s4865_s23 + $0xf90] sm:$0xff]  ;;  %v2474_v30 = vpack.c.bf16 %v558_v20, %v554_v19  ;;  %v1232_v16 = vld [vmem:[%s4848_s4 + $0xd8] sm:$0xff]  ;;  %v1229_v19 = vld [vmem:[%s4848_s4 + $0xc0] sm:$0xff] }
  0xdd   :  { %2181 = vmatpush1.bf16.msra.mxu0 %v2180_v22  ;;  %v2202_v22 = vpack.c.bf16 %v524_v35, %v520_v34  ;;  %v562_v34 = vld [vmem:[%s4865_s23 + $0xfd8] sm:$0xff]  ;;  %v2476_v38 = vpack.c.bf16 %v557_v31, %v553_v29  ;;  %v1231_v20 = vld [vmem:[%s4848_s4 + $0xd0] sm:$0xff] }
  0xde   :  { %2437 = vmatpush1.bf16.msra.mxu1 %v2436_v41  ;;  %2183 = vmatprep.subr.bf16.mxu0 %v2182_v42  ;;  %v519_v41 = vld [vmem:[%s4865_s23 + $0xe80] sm:$0xff]  ;;  %v566_v35 = vld [vmem:[%s4865_s23 + $0xff8] sm:$0xff]  ;;  %v1235_v29 = vld [vmem:[%s4848_s4 + $0xf0] sm:$0xff] }
  0xdf   :  { %2439 = vmatprep.subr.bf16.mxu1 %v2438_v46  ;;  %v523_v42 = vld [vmem:[%s4865_s23 + $0xea0] sm:$0xff]  ;;  %v528_v46 = vld [vmem:[%s4865_s23 + $0xec8] sm:$0xff]  ;;  %v1240_v31 = vld [vmem:[%s4848_s4 + $0x118] sm:$0xff] }
  0xe0   :  { %v2204_v49 = vpack.c.bf16 %v523_v42, %v519_v41  ;;  %v561_v41 = vld [vmem:[%s4865_s23 + $0xfd0] sm:$0xff]  ;;  %v2478_v42 = vpack.c.bf16 %v566_v35, %v562_v34  ;;  %v1237_v34 = vld [vmem:[%s4848_s4 + $0x100] sm:$0xff] }
  0xe1   :  { %2185 = vmatpush1.bf16.msra.mxu0 %v2184_v52  ;;  %v2206_v52 = vpack.c.bf16 %v532_v47, %v528_v46  ;;  %v2480_v47 = vpack.c.bf16 %v565_v43, %v561_v41  ;;  %v1239_v35 = vld [vmem:[%s4848_s4 + $0x110] sm:$0xff]  ;;  %v1248_v43 = vld [vmem:[%s4848_s4 + $0x158] sm:$0xff] }
  0xe2   :  { %2441 = vmatpush1.bf16.msra.mxu1 %v2440_v53  ;;  %2187 = vmatprep.subr.bf16.mxu0 %v2186_v54  ;;  %v527_v53 = vld [vmem:[%s4865_s23 + $0xec0] sm:$0xff]  ;;  %v1243_v41 = vld [vmem:[%s4848_s4 + $0x130] sm:$0xff] }
  0xe3   :  { %2443 = vmatprep.subr.bf16.mxu1 %v2442_v57  ;;  %v531_v54 = vld [vmem:[%s4865_s23 + $0xee0] sm:$0xff]  ;;  %v536_v57 = vld [vmem:[%s4865_s23 + $0xf08] sm:$0xff] }
  0xe4   :  { %v2208_v60 = vpack.c.bf16 %v531_v54, %v527_v53 }
  0xe5   :  { %2189 = vmatpush1.bf16.msra.mxu0 %v2188_v63  ;;  %v2210_v63 = vpack.c.bf16 %v540_v58, %v536_v57  ;;  %v1216_v57 = vld [vmem:[%s4848_s4 + $0x58] sm:$0xff] }
  0xe6   :  { %2445 = vmatpush1.bf16.msra.mxu1 %v2444_v0  ;;  %2191 = vmatprep.subr.bf16.mxu0 %v2190_v1  ;;  %v535_v0 = vld [vmem:[%s4865_s23 + $0xf00] sm:$0xff]  ;;  %v2490_v24 = vpack.c.bf16 %v1216_v57, %v1214_v11 }
  0xe7   :  { %2447 = vmatprep.subr.bf16.mxu1 %v2446_v5  ;;  %v539_v1 = vld [vmem:[%s4865_s23 + $0xf20] sm:$0xff]  ;;  %v544_v5 = vld [vmem:[%s4865_s23 + $0xf48] sm:$0xff] }
  0xe8   :  { %v2212_v8 = vpack.c.bf16 %v539_v1, %v535_v0  ;;  %v1217_v1 = vld [vmem:[%s4848_s4 + $0x60] sm:$0xff] }
  0xe9   :  { %2193 = vmatpush1.bf16.msra.mxu0 %v2192_v10  ;;  %v2214_v10 = vpack.c.bf16 %v548_v6, %v544_v5  ;;  %v2496_v5 = vpack.c.bf16 %v1219_v2, %v1217_v1  ;;  %v1253_v57 = vld [vmem:[%s4848_s4 + $0x180] sm:$0xff]  ;;  %v1264_v1 = vld [vmem:[%s4848_s4 + $0x1d8] sm:$0xff] }
  0xea   :  { %2449 = vmatpush1.bf16.msra.mxu1 %v2448_v12  ;;  %2195 = vmatprep.subr.bf16.mxu0 %v2194_v13  ;;  %v543_v12 = vld [vmem:[%s4865_s23 + $0xf40] sm:$0xff] }
  0xeb   :  { %2451 = vmatprep.subr.bf16.mxu1 %v2450_v17  ;;  %v547_v13 = vld [vmem:[%s4865_s23 + $0xf60] sm:$0xff]  ;;  %v552_v17 = vld [vmem:[%s4865_s23 + $0xf88] sm:$0xff] }
  0xec   :  { %v2216_v21 = vpack.c.bf16 %v547_v13, %v543_v12  ;;  %v1225_v13 = vld [vmem:[%s4848_s4 + $0xa0] sm:$0xff] }
  0xed   :  { %2197 = vmatpush1.bf16.msra.mxu0 %v2196_v26  ;;  %v2218_v26 = vpack.c.bf16 %v556_v18, %v552_v17  ;;  %v2504_v17 = vpack.c.bf16 %v1227_v14, %v1225_v13  ;;  %v1270_v13 = vld [vmem:[%s4848_s4 + $0x208] sm:$0xff]  ;;  %v1272_v14 = vld [vmem:[%s4848_s4 + $0x218] sm:$0xff] }
  0xee   :  { %2453 = vmatpush1.bf16.msra.mxu1 %v2452_v27  ;;  %2199 = vmatprep.subr.bf16.mxu0 %v2198_v28  ;;  %v551_v27 = vld [vmem:[%s4865_s23 + $0xf80] sm:$0xff] }
  0xef   :  { %2455 = vmatprep.subr.bf16.mxu1 %v2454_v32  ;;  %v555_v28 = vld [vmem:[%s4865_s23 + $0xfa0] sm:$0xff]  ;;  %v560_v32 = vld [vmem:[%s4865_s23 + $0xfc8] sm:$0xff] }
  0xf0   :  { %v2220_v36 = vpack.c.bf16 %v555_v28, %v551_v27  ;;  %v1233_v28 = vld [vmem:[%s4848_s4 + $0xe0] sm:$0xff] }
  0xf1   :  { %2201 = vmatpush1.bf16.msra.mxu0 %v2200_v39  ;;  %v2222_v39 = vpack.c.bf16 %v564_v33, %v560_v32  ;;  %v2512_v32 = vpack.c.bf16 %v1235_v29, %v1233_v28  ;;  %v1469_v29 = vld [vmem:[%s4849_s6 + $0x30] sm:$0xff] }
  0xf2   :  { %2457 = vmatpush1.bf16.msra.mxu1 %v2456_v40  ;;  %2203 = vmatprep.subr.bf16.mxu0 %v2202_v22  ;;  %v559_v40 = vld [vmem:[%s4865_s23 + $0xfc0] sm:$0xff] }
  0xf3   :  { %2459 = vmatprep.subr.bf16.mxu1 %v2458_v44  ;;  %v563_v22 = vld [vmem:[%s4865_s23 + $0xfe0] sm:$0xff]  ;;  %v1206_v44 = vld [vmem:[%s4848_s4 + $0x8] sm:$0xff] }
  0xf4   :  { %v2224_v46 = vpack.c.bf16 %v563_v22, %v559_v40  ;;  %v2482_v25 = vpack.c.bf16 %v1208_v45, %v1206_v44  ;;  %v1241_v22 = vld [vmem:[%s4848_s4 + $0x120] sm:$0xff] }
  0xf5   :  { %2205 = vmatpush1.bf16.msra.mxu0 %v2204_v49  ;;  %v1207_v49 = vld [vmem:[%s4848_s4 + $0x10] sm:$0xff]  ;;  %v2520_v44 = vpack.c.bf16 %v1243_v41, %v1241_v22 }
  0xf6   :  { %2461 = vmatpush1.bf16.msra.mxu1 %v2460_v51  ;;  %2207 = vmatprep.subr.bf16.mxu0 %v2206_v52  ;;  %v1210_v51 = vld [vmem:[%s4848_s4 + $0x28] sm:$0xff]  ;;  %v1212_v52 = vld [vmem:[%s4848_s4 + $0x38] sm:$0xff]  ;;  %v2484_v53 = vpack.c.bf16 %v1207_v49, %v1205_v48  ;;  %v1477_v41 = vld [vmem:[%s4849_s6 + $0x70] sm:$0xff] }
  0xf7   :  { %2463 = vmatprep.subr.bf16.mxu1 %v2462_v56  ;;  %v2486_v54 = vpack.c.bf16 %v1212_v52, %v1210_v51  ;;  %v1211_v56 = vld [vmem:[%s4848_s4 + $0x30] sm:$0xff]  ;;  %v1252_v48 = vld [vmem:[%s4848_s4 + $0x178] sm:$0xff]  ;;  %v1249_v52 = vld [vmem:[%s4848_s4 + $0x160] sm:$0xff] }
  0xf8   :  { %v2488_v58 = vpack.c.bf16 %v1211_v56, %v1209_v55  ;;  %v1256_v55 = vld [vmem:[%s4848_s4 + $0x198] sm:$0xff] }
  0xf9   :  { %2209 = vmatpush1.bf16.msra.mxu0 %v2208_v60  ;;  %v1215_v60 = vld [vmem:[%s4848_s4 + $0x50] sm:$0xff] }
  0xfa   :  { %2465 = vmatpush1.bf16.msra.mxu1 %v2464_v62  ;;  %2211 = vmatprep.subr.bf16.mxu0 %v2210_v63  ;;  %v1218_v62 = vld [vmem:[%s4848_s4 + $0x68] sm:$0xff]  ;;  %v2492_v63 = vpack.c.bf16 %v1215_v60, %v1213_v59  ;;  %v1260_v59 = vld [vmem:[%s4848_s4 + $0x1b8] sm:$0xff] }
  0xfb   :  { %2467 = vmatprep.subr.bf16.mxu1 %v2466_v3  ;;  %v1222_v3 = vld [vmem:[%s4848_s4 + $0x88] sm:$0xff] }
  0xfc   :  { %v2498_v6 = vpack.c.bf16 %v1224_v4, %v1222_v3  ;;  %v1261_v4 = vld [vmem:[%s4848_s4 + $0x1c0] sm:$0xff] }
  0xfd   :  { %2213 = vmatpush1.bf16.msra.mxu0 %v2212_v8  ;;  %v1226_v8 = vld [vmem:[%s4848_s4 + $0xa8] sm:$0xff] }
  0xfe   :  { %2469 = vmatpush1.bf16.msra.mxu1 %v2468_v9  ;;  %2215 = vmatprep.subr.bf16.mxu0 %v2214_v10  ;;  %v1228_v9 = vld [vmem:[%s4848_s4 + $0xb8] sm:$0xff]  ;;  %v2500_v10 = vpack.c.bf16 %v1223_v37, %v1221_v7  ;;  %v1266_v7 = vld [vmem:[%s4848_s4 + $0x1e8] sm:$0xff] }
  0xff   :  { %2471 = vmatprep.subr.bf16.mxu1 %v2470_v15  ;;  %v2502_v12 = vpack.c.bf16 %v1228_v9, %v1226_v8  ;;  %v1230_v15 = vld [vmem:[%s4848_s4 + $0xc8] sm:$0xff]  ;;  %v1268_v37 = vld [vmem:[%s4848_s4 + $0x1f8] sm:$0xff]  ;;  %v1265_v9 = vld [vmem:[%s4848_s4 + $0x1e0] sm:$0xff] }
 0x100   :  { %v2506_v18 = vpack.c.bf16 %v1232_v16, %v1230_v15  ;;  %v2542_v8 = vpack.c.bf16 %v1268_v37, %v1266_v7  ;;  %v2546_v15 = vpack.c.bf16 %v1272_v14, %v1270_v13  ;;  %v2671_v16 = vmov 0.0|0.0   ;;  %v1280_v13 = vld [vmem:[%s4848_s4 + $0x258] sm:$0xff] }
 0x101   :  { %2217 = vmatpush1.bf16.msra.mxu0 %v2216_v21  ;;  %v1234_v21 = vld [vmem:[%s4848_s4 + $0xe8] sm:$0xff] }
 0x102   :  { %2473 = vmatpush1.bf16.msra.mxu1 %v2472_v23  ;;  %2219 = vmatprep.subr.bf16.mxu0 %v2218_v26  ;;  %v1236_v23 = vld [vmem:[%s4848_s4 + $0xf8] sm:$0xff]  ;;  %v2508_v26 = vpack.c.bf16 %v1231_v20, %v1229_v19  ;;  %v1465_v19 = vld [vmem:[%s4849_s6 + $0x10] sm:$0xff] }
 0x103   :  { %2475 = vmatprep.subr.bf16.mxu1 %v2474_v30  ;;  %v2510_v27 = vpack.c.bf16 %v1236_v23, %v1234_v21  ;;  %v1238_v30 = vld [vmem:[%s4848_s4 + $0x108] sm:$0xff]  ;;  %v1466_v21 = vld [vmem:[%s4849_s6 + $0x18] sm:$0xff] }
 0x104   :  { %v2514_v33 = vpack.c.bf16 %v1240_v31, %v1238_v30  ;;  %v2582_v23 = vpack.c.bf16 %v1466_v21, %v1465_v19  ;;  %v1470_v30 = vld [vmem:[%s4849_s6 + $0x38] sm:$0xff]  ;;  %v1282_v19 = vld [vmem:[%s4848_s4 + $0x268] sm:$0xff] }
 0x105   :  { %2221 = vmatpush1.bf16.msra.mxu0 %v2220_v36  ;;  %v1242_v36 = vld [vmem:[%s4848_s4 + $0x128] sm:$0xff]  ;;  %v2588_v31 = vpack.c.bf16 %v1470_v30, %v1469_v29  ;;  %v1288_v29 = vld [vmem:[%s4848_s4 + $0x298] sm:$0xff] }
 0x106   :  { %2477 = vmatpush1.bf16.msra.mxu1 %v2476_v38  ;;  %2223 = vmatprep.subr.bf16.mxu0 %v2222_v39  ;;  %v1244_v38 = vld [vmem:[%s4848_s4 + $0x138] sm:$0xff]  ;;  %v2516_v39 = vpack.c.bf16 %v1239_v35, %v1237_v34  ;;  %v1473_v35 = vld [vmem:[%s4849_s6 + $0x50] sm:$0xff] }
 0x107   :  { %2479 = vmatprep.subr.bf16.mxu1 %v2478_v42  ;;  %v2518_v40 = vpack.c.bf16 %v1244_v38, %v1242_v36  ;;  %v1246_v42 = vld [vmem:[%s4848_s4 + $0x148] sm:$0xff]  ;;  %v1474_v36 = vld [vmem:[%s4849_s6 + $0x58] sm:$0xff] }
 0x108   :  { %v2522_v45 = vpack.c.bf16 %v1248_v43, %v1246_v42  ;;  %v2594_v38 = vpack.c.bf16 %v1474_v36, %v1473_v35  ;;  %v1478_v42 = vld [vmem:[%s4849_s6 + $0x78] sm:$0xff] }
 0x109   :  { %2225 = vmatpush1.bf16.msra.mxu0 %v2224_v46  ;;  %v1245_v46 = vld [vmem:[%s4848_s4 + $0x140] sm:$0xff]  ;;  %v2600_v43 = vpack.c.bf16 %v1478_v42, %v1477_v41  ;;  %v1292_v35 = vld [vmem:[%s4848_s4 + $0x2b8] sm:$0xff] }
 0x10a   :  { %2481 = vmatpush1.bf16.msra.mxu1 %v2480_v47  ;;  %2483 = vmatprep.subr.bf16.mxu0 %v2482_v25  ;;  %v1247_v47 = vld [vmem:[%s4848_s4 + $0x150] sm:$0xff]  ;;  %v1250_v25 = vld [vmem:[%s4848_s4 + $0x168] sm:$0xff]  ;;  %v1296_v41 = vld [vmem:[%s4848_s4 + $0x2d8] sm:$0xff] }
 0x10b   :  { %v2524_v49 = vpack.c.bf16 %v1247_v47, %v1245_v46  ;;  %v2526_v51 = vpack.c.bf16 %v1252_v48, %v1250_v25  ;;  %2578 = vmatprep.subr.bf16.mxu1 %v2671_v16  ;;  %v1481_v47 = vld [vmem:[%s4849_s6 + $0x90] sm:$0xff]  ;;  %v1482_v25 = vld [vmem:[%s4849_s6 + $0x98] sm:$0xff] }
 0x10c   :  { %911 = vmatmul.mubr.f32.vlgmr.msra.gmra.mrb[0].mxu0 %v3984_v50  ;;  %v2606_v48 = vpack.c.bf16 %v1482_v25, %v1481_v47  ;;  %v1300_v47 = vld [vmem:[%s4848_s4 + $0x2f8] sm:$0xff]  ;;  %v579_v25 = vsub.s32 2, %v3013_v61 }
 0x10d   :  { %1195 = vmatmul.mubr.f32.vlgmr.msra.gmra.mrb[0].mxu1 %v3984_v50  ;;  %2485 = vmatpush1.bf16.msra.mxu0 %v2484_v53  ;;  %v1220_v50 = vld [vmem:[%s4848_s4 + $0x78] sm:$0xff]  ;;  %v1251_v53 = vld [vmem:[%s4848_s4 + $0x170] sm:$0xff] }
 0x10e   :  { %2487 = vmatprep.subr.bf16.mxu0 %v2486_v54  ;;  %v2494_v0 = vpack.c.bf16 %v1220_v50, %v1218_v62  ;;  %v1254_v54 = vld [vmem:[%s4848_s4 + $0x188] sm:$0xff]  ;;  %v2528_v56 = vpack.c.bf16 %v1251_v53, %v1249_v52  ;;  %v1257_v50 = vld [vmem:[%s4848_s4 + $0x1a0] sm:$0xff]  ;;  %v571_v53 = vsub.s32 0, %v3013_v61 }
 0x10f   :  { %v2530_v11 = vpack.c.bf16 %v1256_v55, %v1254_v54  ;;  %v4626_v54 = vld [vmem:[%s4850_s3] sm:$0xf]  ;;  %v575_v55 = vsub.s32 1, %v3013_v61 }
 0x111   :  { %2489 = vmatpush1.bf16.msra.mxu0 %v2488_v58  ;;  %v1255_v58 = vld [vmem:[%s4848_s4 + $0x190] sm:$0xff] }
 0x112   :  { %2491 = vmatprep.subr.bf16.mxu0 %v2490_v24  ;;  %v1258_v24 = vld [vmem:[%s4848_s4 + $0x1a8] sm:$0xff]  ;;  %v2532_v60 = vpack.c.bf16 %v1255_v58, %v1253_v57  ;;  %v576_v57 = vrot.slane %v4626_v54, %v575_v55 }
 0x113   :  { %v2534_v62 = vpack.c.bf16 %v1260_v59, %v1258_v24 }
 0x115   :  { %2493 = vmatpush1.bf16.msra.mxu0 %v2492_v63  ;;  %v1259_v63 = vld [vmem:[%s4848_s4 + $0x1b0] sm:$0xff] }
 0x116   :  { %2495 = vmatprep.subr.bf16.mxu0 %v2494_v0  ;;  %v1262_v0 = vld [vmem:[%s4848_s4 + $0x1c8] sm:$0xff]  ;;  %v2536_v2 = vpack.c.bf16 %v1259_v63, %v1257_v50  ;;  %v1269_v50 = vld [vmem:[%s4848_s4 + $0x200] sm:$0xff]  ;;  %v1271_v63 = vld [vmem:[%s4848_s4 + $0x210] sm:$0xff] }
 0x117   :  { %v2538_v3 = vpack.c.bf16 %v1264_v1, %v1262_v0 }
 0x119   :  { %2497 = vmatpush1.bf16.msra.mxu0 %v2496_v5  ;;  %v1263_v5 = vld [vmem:[%s4848_s4 + $0x1d0] sm:$0xff] }
 0x11a   :  { %2499 = vmatprep.subr.bf16.mxu0 %v2498_v6  ;;  %v2540_v6 = vpack.c.bf16 %v1263_v5, %v1261_v4 }
 0x11d   :  { %2501 = vmatpush1.bf16.msra.mxu0 %v2500_v10  ;;  %v1267_v10 = vld [vmem:[%s4848_s4 + $0x1f0] sm:$0xff] }
 0x11e   :  { %2503 = vmatprep.subr.bf16.mxu0 %v2502_v12  ;;  %v2544_v12 = vpack.c.bf16 %v1267_v10, %v1265_v9  ;;  %v1275_v9 = vld [vmem:[%s4848_s4 + $0x230] sm:$0xff] }
 0x121   :  { %2505 = vmatpush1.bf16.msra.mxu0 %v2504_v17  ;;  %v1463_v17 = vld [vmem:[%s4849_s6] sm:$0xff] }
 0x122   :  { %2507 = vmatprep.subr.bf16.mxu0 %v2506_v18  ;;  %v1464_v18 = vld [vmem:[%s4849_s6 + $0x8] sm:$0xff] }
 0x123   :  { %v2579_v20 = vpack.c.bf16 %v1464_v18, %v1463_v17  ;;  %v1277_v17 = vld [vmem:[%s4848_s4 + $0x240] sm:$0xff]  ;;  %v1279_v18 = vld [vmem:[%s4848_s4 + $0x250] sm:$0xff] }
 0x124   :  { %v2556_v21 = vpack.c.bf16 %v1279_v18, %v1277_v17  ;;  %v1600_v17 = vld [vmem:[%s4853_s10] sm:$0xff]  ;;  %v1601_v18 = vld [vmem:[%s4853_s10 + $0x8] sm:$0xff] }
 0x125   :  { %2509 = vmatpush1.bf16.msra.mxu0 %v2508_v26  ;;  %2580 = vmatpush1.bf16.msra.mxu1 %v2579_v20  ;;  %v1467_v26 = vld [vmem:[%s4849_s6 + $0x20] sm:$0xff]  ;;  %v1284_v20 = vld [vmem:[%s4848_s4 + $0x278] sm:$0xff] }
 0x126   :  { %2511 = vmatprep.subr.bf16.mxu0 %v2510_v27  ;;  %2581 = vmatprep.subr.bf16.mxu1 %v2671_v16  ;;  %v1468_v27 = vld [vmem:[%s4849_s6 + $0x28] sm:$0xff] }
 0x127   :  { %v2585_v28 = vpack.c.bf16 %v1468_v27, %v1467_v26  ;;  %v1281_v26 = vld [vmem:[%s4848_s4 + $0x260] sm:$0xff]  ;;  %v1283_v27 = vld [vmem:[%s4848_s4 + $0x270] sm:$0xff] }
 0x128   :  { %v2560_v30 = vpack.c.bf16 %v1283_v27, %v1281_v26 }
 0x129   :  { %2513 = vmatpush1.bf16.msra.mxu0 %v2512_v32  ;;  %2583 = vmatpush1.bf16.msra.mxu1 %v2582_v23  ;;  %v1471_v32 = vld [vmem:[%s4849_s6 + $0x40] sm:$0xff]  ;;  %v2558_v23 = vpack.c.bf16 %v1284_v20, %v1282_v19  ;;  %v2615_v19 = vpack.c.bf16 %v1601_v18, %v1600_v17  ;;  %v1602_v20 = vld [vmem:[%s4853_s10 + $0x10] sm:$0xff] }
 0x12a   :  { %2515 = vmatprep.subr.bf16.mxu0 %v2514_v33  ;;  %2584 = vmatprep.subr.bf16.mxu1 %v2671_v16  ;;  %v1472_v33 = vld [vmem:[%s4849_s6 + $0x48] sm:$0xff] }
 0x12b   :  { %v2591_v34 = vpack.c.bf16 %v1472_v33, %v1471_v32  ;;  %v1285_v32 = vld [vmem:[%s4848_s4 + $0x280] sm:$0xff]  ;;  %v1287_v33 = vld [vmem:[%s4848_s4 + $0x290] sm:$0xff] }
 0x12c   :  { %v2564_v36 = vpack.c.bf16 %v1287_v33, %v1285_v32  ;;  %v1686_v32 = vld [vmem:[%s4855_s12] sm:$0xff]  ;;  %v1687_v33 = vld [vmem:[%s4855_s12 + $0x8] sm:$0xff] }
 0x12d   :  { %2517 = vmatpush1.bf16.msra.mxu0 %v2516_v39  ;;  %2586 = vmatpush1.bf16.msra.mxu1 %v2585_v28  ;;  %v1475_v39 = vld [vmem:[%s4849_s6 + $0x60] sm:$0xff]  ;;  %v1286_v28 = vld [vmem:[%s4848_s4 + $0x288] sm:$0xff] }
 0x12e   :  { %2519 = vmatprep.subr.bf16.mxu0 %v2518_v40  ;;  %2587 = vmatprep.subr.bf16.mxu1 %v2671_v16  ;;  %v1476_v40 = vld [vmem:[%s4849_s6 + $0x68] sm:$0xff] }
 0x12f   :  { %v2597_v22 = vpack.c.bf16 %v1476_v40, %v1475_v39  ;;  %v1289_v39 = vld [vmem:[%s4848_s4 + $0x2a0] sm:$0xff]  ;;  %v1291_v40 = vld [vmem:[%s4848_s4 + $0x2b0] sm:$0xff] }
 0x130   :  { %v2568_v42 = vpack.c.bf16 %v1291_v40, %v1289_v39  ;;  %v1688_v39 = vld [vmem:[%s4855_s12 + $0x10] sm:$0xff]  ;;  %v1689_v40 = vld [vmem:[%s4855_s12 + $0x18] sm:$0xff] }
 0x131   :  { %2521 = vmatpush1.bf16.msra.mxu0 %v2520_v44  ;;  %2589 = vmatpush1.bf16.msra.mxu1 %v2588_v31  ;;  %v1479_v44 = vld [vmem:[%s4849_s6 + $0x80] sm:$0xff]  ;;  %v2562_v31 = vpack.c.bf16 %v1288_v29, %v1286_v28 }
 0x132   :  { %2523 = vmatprep.subr.bf16.mxu0 %v2522_v45  ;;  %2590 = vmatprep.subr.bf16.mxu1 %v2671_v16  ;;  %v1480_v45 = vld [vmem:[%s4849_s6 + $0x88] sm:$0xff] }
 0x133   :  { %v2603_v46 = vpack.c.bf16 %v1480_v45, %v1479_v44  ;;  %v1293_v44 = vld [vmem:[%s4848_s4 + $0x2c0] sm:$0xff]  ;;  %v1295_v45 = vld [vmem:[%s4848_s4 + $0x2d0] sm:$0xff] }
 0x135   :  { %2525 = vmatpush1.bf16.msra.mxu0 %v2524_v49  ;;  %2592 = vmatpush1.bf16.msra.mxu1 %v2591_v34  ;;  %v1483_v49 = vld [vmem:[%s4849_s6 + $0xa0] sm:$0xff]  ;;  %v1290_v34 = vld [vmem:[%s4848_s4 + $0x2a8] sm:$0xff] }
 0x136   :  { %2527 = vmatprep.subr.bf16.mxu0 %v2526_v51  ;;  %2593 = vmatprep.subr.bf16.mxu1 %v2671_v16  ;;  %v1484_v51 = vld [vmem:[%s4849_s6 + $0xa8] sm:$0xff] }
 0x137   :  { %v2609_v52 = vpack.c.bf16 %v1484_v51, %v1483_v49  ;;  %v1297_v51 = vld [vmem:[%s4848_s4 + $0x2e0] sm:$0xff] }
 0x139   :  { %2529 = vmatpush1.bf16.msra.mxu0 %v2528_v56  ;;  %2595 = vmatpush1.bf16.msra.mxu1 %v2594_v38  ;;  %v583_v56 = vsub.s32 3, %v3013_v61  ;;  %v2566_v38 = vpack.c.bf16 %v1292_v35, %v1290_v34  ;;  %v1914_v34 = vld [vmem:[%s4856_s9] ss:$0 sm:$0xff] }
 0x13a   :  { %2531 = vmatprep.subr.bf16.mxu0 %v2530_v11  ;;  %2596 = vmatprep.subr.bf16.mxu1 %v2671_v16  ;;  %v572_v11 = vrot.slane %v4626_v54, %v571_v53 }
 0x13b   :  { %v584_v58 = vrot.slane %v4626_v54, %v583_v56  ;;  %v580_v56 = vrot.slane %v4626_v54, %v579_v25  ;;  %v1485_v54 = vld [vmem:[%s4849_s6 + $0xb0] sm:$0xff] }
 0x13d   :  { %2533 = vmatpush1.bf16.msra.mxu0 %v2532_v60  ;;  %2598 = vmatpush1.bf16.msra.mxu1 %v2597_v22  ;;  %v1294_v22 = vld [vmem:[%s4848_s4 + $0x2c8] sm:$0xff] }
 0x13e   :  { %2535 = vmatprep.subr.bf16.mxu0 %v2534_v62  ;;  %2599 = vmatprep.subr.bf16.mxu1 %v2671_v16 }
 0x141   :  { %2537 = vmatpush1.bf16.msra.mxu0 %v2536_v2  ;;  %2601 = vmatpush1.bf16.msra.mxu1 %v2600_v43  ;;  %v1274_v2 = vld [vmem:[%s4848_s4 + $0x228] sm:$0xff]  ;;  %v2570_v43 = vpack.c.bf16 %v1296_v41, %v1294_v22  ;;  %v2624_v22 = vpack.c.bf16 %v1689_v40, %v1688_v39  ;;  %v1915_v41 = vld [vmem:[%s4857_s11] ss:$0 sm:$0xff] }
 0x142   :  { %2539 = vmatprep.subr.bf16.mxu0 %v2538_v3  ;;  %2602 = vmatprep.subr.bf16.mxu1 %v2671_v16  ;;  %v1276_v3 = vld [vmem:[%s4848_s4 + $0x238] sm:$0xff] }
 0x143   :  { %v2550_v37 = vpack.c.bf16 %v1276_v3, %v1274_v2 }
 0x145   :  { %2541 = vmatpush1.bf16.msra.mxu0 %v2540_v6  ;;  %2604 = vmatpush1.bf16.msra.mxu1 %v2603_v46  ;;  %v2548_v6 = vpack.c.bf16 %v1271_v63, %v1269_v50  ;;  %v1298_v46 = vld [vmem:[%s4848_s4 + $0x2e8] sm:$0xff]  ;;  %v2672_v63 = vmov 0.0  }
 0x146   :  { %2543 = vmatprep.subr.bf16.mxu0 %v2542_v8  ;;  %2605 = vmatprep.subr.bf16.mxu1 %v2671_v16  ;;  %v1273_v8 = vld [vmem:[%s4848_s4 + $0x220] sm:$0xff]  ;;  %v2574_v49 = vpack.c.bf16 %v1300_v47, %v1298_v46  ;;  %1891 = vst [vmem:[%s4860_s16] sm:$0x3] %v2672_v63 }
 0x147   :  { %v2552_v14 = vpack.c.bf16 %v1275_v9, %v1273_v8  ;;  %v1911_v8 = vld [vmem:[%s4852_s7] ss:$0 sm:$0xff] }
 0x149   :  { %2545 = vmatpush1.bf16.msra.mxu0 %v2544_v12  ;;  %2607 = vmatpush1.bf16.msra.mxu1 %v2606_v48  ;;  %v1278_v12 = vld [vmem:[%s4848_s4 + $0x248] sm:$0xff]  ;;  %v2572_v48 = vpack.c.bf16 %v1295_v45, %v1293_v44 }
 0x14a   :  { %2547 = vmatprep.subr.bf16.mxu0 %v2546_v15  ;;  %2608 = vmatprep.subr.bf16.mxu1 %v2671_v16  ;;  %v2554_v15 = vpack.c.bf16 %v1280_v13, %v1278_v12 }
 0x14d   :  { %2610 = vmatpush1.bf16.msra.mxu1 %v2609_v52  ;;  %v1299_v52 = vld [vmem:[%s4848_s4 + $0x2f0] sm:$0xff] }
 0x14e   :  { %2611 = vmatprep.subr.bf16.mxu1 %v2671_v16 }
 0x1df   :  { %v912_v24 = vpop.f32.mrb[0].mxu0 }
 0x1e0   :  { %v2632_v59 = vadd.f32 %v912_v24, %v572_v11  ;;  %v4637_v60 = vpop.f32.mrb[0].mxu1  ;;  %v914_v62 = vpop.f32.mrb[1].mxu0  ;;  %v2576_v11 = vpack.c.bf16 %v1299_v52, %v1297_v51  ;;  %v1301_v24 = vld [vmem:[%s4848_s4 + $0x300] sm:$0xff] }
 0x1e1   :  { %v2633_v0 = vadd.f32 %v914_v62, %v576_v57  ;;  %v1198_v1 = vpop.f32.mrb[1].mxu1  ;;  %v1302_v57 = vld [vmem:[%s4848_s4 + $0x308] sm:$0xff]  ;;  %v1486_v62 = vld [vmem:[%s4849_s6 + $0xb8] sm:$0xff]  ;;  %v1917_v52 = vld [vmem:[%s4859_s13] ss:$0 sm:$0xff] }
 0x1e2   :  { %v2635_v4 = vadd.f32 %v1198_v1, %v584_v58  ;;  %v1201_v7 = vmax.f32 %v2632_v59, 0.0  ;;  %v2634_v58 = vadd.f32 %v4637_v60, %v580_v56  ;;  %v2612_v50 = vpack.c.bf16 %v1486_v62, %v1485_v54  ;;  %v1487_v60 = vld [vmem:[%s4849_s6 + $0xc0] sm:$0xff] }
 0x1e3   :  { %v1202_v5 = vmax.f32 %v2633_v0, 0.0  ;;  %v1303_v0 = vld [vmem:[%s4851_s5] sm:$0x3] }
 0x1e4   :  { %v1204_v10 = vmax.f32 %v2635_v4, 0.0  ;;  %v1203_v59 = vmax.f32 %v2634_v58, 0.0  ;;  %2613 = vmatpush1.bf16.msra.mxu1 %v2612_v50  ;;  %v1308_v1 = vrot.slane %v1303_v0, %v571_v53  ;;  %v1312_v2 = vrot.slane %v1303_v0, %v575_v55 }
 0x1e5   :  { %1383 = vmatprep.mubr.f32.mxu0 %v1202_v5  ;;  %1547 = vmatprep.subr.mxu1 %v2672_v63 }
 0x1e6   :  { %1384 = vmatmul.mubr.f32.vlgmr.msra.gmra.mrb[2].mxu0 %v1201_v7 }
 0x1e7   :  { %2549 = vmatpush1.bf16.msra.mxu0 %v2548_v6  ;;  %1910 = vmatprep.mubr.msk.f32.mxu0 %vm1315_vm0, %v1204_v10 }
 0x1e8   :  { %2551 = vmatprep.subr.bf16.mxu0 %v2550_v37  ;;  %1548 = vmatpush1.msra.mxu1 %v1487_v60 }
 0x1e9   :  { %2614 = vmatprep.subr.bf16.mxu1 %v2671_v16 }
 0x1eb   :  { %2553 = vmatpush1.bf16.msra.mxu0 %v2552_v14 }
 0x1ec   :  { %2555 = vmatprep.subr.bf16.mxu0 %v2554_v15 }
 0x1ef   :  { %2557 = vmatpush1.bf16.msra.mxu0 %v2556_v21  ;;  %v1603_v21 = vld [vmem:[%s4853_s10 + $0x18] sm:$0xff] }
 0x1f0   :  { %2559 = vmatprep.subr.bf16.mxu0 %v2558_v23  ;;  %v2618_v23 = vpack.c.bf16 %v1603_v21, %v1602_v20 }
 0x1f3   :  { %2561 = vmatpush1.bf16.msra.mxu0 %v2560_v30  ;;  %v1913_v30 = vld [vmem:[%s4854_s8] ss:$0 sm:$0xff] }
 0x1f4   :  { %2563 = vmatprep.subr.bf16.mxu0 %v2562_v31 }
 0x1f7   :  { %2565 = vmatpush1.bf16.msra.mxu0 %v2564_v36  ;;  %v2621_v36 = vpack.c.bf16 %v1687_v33, %v1686_v32 }
 0x1f8   :  { %2567 = vmatprep.subr.bf16.mxu0 %v2566_v38 }
 0x1fb   :  { %2569 = vmatpush1.bf16.msra.mxu0 %v2568_v42  ;;  %v1771_v42 = vld [vmem:[%s4858_s14] sm:$0xff] }
 0x1fc   :  { %2571 = vmatprep.subr.bf16.mxu0 %v2570_v43  ;;  %v1772_v43 = vld [vmem:[%s4858_s14 + $0x8] sm:$0xff] }
 0x1fd   :  { %v2627_v47 = vpack.c.bf16 %v1772_v43, %v1771_v42 }
 0x1ff   :  { %2573 = vmatpush1.bf16.msra.mxu0 %v2572_v48  ;;  %v1773_v48 = vld [vmem:[%s4858_s14 + $0x10] sm:$0xff] }
 0x200   :  { %2575 = vmatprep.subr.bf16.mxu0 %v2574_v49  ;;  %v1774_v49 = vld [vmem:[%s4858_s14 + $0x18] sm:$0xff] }
 0x201   :  { %v2630_v51 = vpack.c.bf16 %v1774_v49, %v1773_v48 }
 0x203   :  { %2577 = vmatpush1.bf16.msra.mxu0 %v2576_v11 }
 0x204   :  { %1422 = vmatprep.subr.mxu0 %v1302_v57 }
 0x207   :  { %1423 = vmatpush1.msra.mxu0 %v1301_v24 }
 0x208   :  { %1455 = vmatmul.mubr.f32.vlgmr.msra.gmra.mrb[2].mxu0 %v1203_v59 }
 0x2db   :  { %v1456_v3 = vpop.f32.mrb[2].mxu0 }
 0x2dc   :  { %v2636_v4 = vadd.f32 %v1456_v3, %v1308_v1  ;;  %v1458_v5 = vpop.f32.mrb[3].mxu0 }
 0x2dd   :  { %v2637_v6 = vadd.f32 %v1458_v5, %v1312_v2  ;;  %v1861_v2 = vld [vmem:[%s4862_s1] sm:$0x3] }
 0x2de   :  { %v1461_v37 = vmax.f32 %v2636_v4, 0.0  ;;  %v1868_v3 = vmul.f32 -0.5, %v1861_v2 }
 0x2df   :  { %v1462_v7 = vmax.f32 %v2637_v6, 0.0 }
 0x2e0   :  { %v1869_v6 = vmul.f32 %v1868_v3, %v1861_v2 }
 0x2e1   :  { %1912 = vmatprep.mubr.msk.f32.mxu1 %vm1495_vm1, %v1462_v7 }
 0x2e2   :  { %1564 = vmatmul.mubr.f32.vlgmr.msra.gmra.mrb[2].mxu1 %v1461_v37 }
 0x2e3   :  { %2616 = vmatpush3.bf16.msra.mxu1 %v2615_v19  ;;  %1945 = vmatprep.mubr.msk.f32.mxu1 %vm2673_vm3, %v2672_v63 }
 0x2e4   :  { %2617 = vmatprep.subr.bf16.mxu1 %v2671_v16 }
 0x2e7   :  { %2619 = vmatpush3.bf16.msra.mxu1 %v2618_v23 }
 0x2e8   :  { %2620 = vmatprep.subr.bf16.mxu1 %v2671_v16 }
 0x3b5   :  { %v1565_v9 = vpop.f32.mrb[2].mxu1 }
 0x3b6   :  { %v1566_v10 = vadd.f32 %v1911_v8, %v1565_v9  ;;  %v1567_v53 = vpop.f32.mrb[3].mxu1 }
 0x3b8   :  { %v1570_v12 = vsel %vm1569_vm2, %v1566_v10, 0.0 }
 0x3b9   :  { %1571 = vadd.xlane.f32.xlu0 %v1570_v12 }
 0x446   :  { %v1572_v61 = vpop.xlane.xlu0 %1571 }
 0x447   :  { %v1574_v55 = vmul.f32 0.03125, %v1572_v61 }
 0x449   :  { %v1575_v13 = vsub.f32 %v1566_v10, %v1574_v55 }
 0x44b   :  { %v1576_v14 = vmul.f32 %v1575_v13, %v1575_v13 }
 0x44d   :  { %v1577_v15 = vsel %vm1569_vm2, %v1576_v14, 0.0 }
 0x44e   :  { %1578 = vadd.xlane.f32.xlu0 %v1577_v15 }
 0x4db   :  { %v1579_v26 = vpop.xlane.xlu0 %1578 }
 0x4dc   :  { %v1580_v27 = vmul.f32 0.03125, %v1579_v26 }
 0x4de   :  { %v1581_v28 = vadd.f32 1e-05, %v1580_v27 }
 0x4e0   :  { %2660 = vrsqrt.f32 %v1581_v28 }
 0x4ea   :  { %v2661_v29 = vpop.eup %2660 }
 0x4eb   :  { %v1583_v31 = vmul.f32 %v2661_v29, %v1575_v13 }
 0x4ed   :  { %v1591_v35 = vmul.f32 %v1913_v30, %v1583_v31 }
 0x4ef   :  { %v1599_v38 = vadd.f32 %v1914_v34, %v1591_v35 }
 0x4f1   :  { %1946 = vmatmul.mubr.msk.f32.vlgmr.msra.gmra.mrb[4].mxu1 %vm1611_vm4, %v1599_v38 }
 0x4f2   :  { %2622 = vmatpush3.bf16.msra.mxu1 %v2621_v36  ;;  %1956 = vmatprep.mubr.msk.f32.mxu1 %vm2673_vm3, %v2672_v63 }
 0x4f3   :  { %2623 = vmatprep.subr.bf16.mxu1 %v2671_v16 }
 0x4f6   :  { %2625 = vmatpush3.bf16.msra.mxu1 %v2624_v22 }
 0x4f7   :  { %2626 = vmatprep.subr.bf16.mxu1 %v2671_v16 }
 0x5c4   :  { %v1681_v44 = vpop.f32.mrb[4].mxu1 }
 0x5c5   :  { %v1682_v45 = vadd.f32 %v1915_v41, %v1681_v44  ;;  %v1947_v46 = vpop.f32.mrb[5].mxu1 }
 0x5c7   :  { %v1685_v25 = vmax.f32 %v1682_v45, 0.0 }
 0x5c9   :  { %1957 = vmatmul.mubr.msk.f32.vlgmr.msra.gmra.mrb[6].mxu1 %vm1611_vm4, %v1685_v25 }
 0x5ca   :  { %2628 = vmatpush3.bf16.msra.mxu1 %v2627_v47  ;;  %1967 = vmatprep.mubr.msk.f32.mxu1 %vm2673_vm3, %v2672_v63 }
 0x5cb   :  { %2629 = vmatprep.subr.bf16.mxu1 %v2671_v16  ;;  %v1919_v16 = vld [vmem:[%s4861_s15] ss:$0 sm:$0xff] }
 0x5ce   :  { %2631 = vmatpush3.bf16.msra.mxu1 %v2630_v51 }
 0x69c   :  { %v1766_v56 = vpop.f32.mrb[6].mxu1 }
 0x69d   :  { %v1767_v11 = vadd.f32 %v1917_v52, %v1766_v56  ;;  %v1958_v57 = vpop.f32.mrb[7].mxu1 }
 0x69f   :  { %v1770_v58 = vmax.f32 %v1767_v11, 0.0 }
 0x6a1   :  { %1968 = vmatmul.mubr.msk.f32.vlgmr.msra.gmra.mrb[8].mxu1 %vm1611_vm4, %v1770_v58 }
 0x774   :  { %v1851_v24 = vpop.f32.mrb[8].mxu1 }
 0x775   :  { %v1852_v59 = vadd.f32 %v1919_v16, %v1851_v24  ;;  %v1969_v54 = vpop.f32.mrb[9].mxu1 }
 0x777   :  { %2662 = vtanh.f32 %v1852_v59 }
 0x781   :  { %v2663_v62 = vpop.eup %2662 }
 0x782   :  { %v1856_v50 = vadd.f32 1.0, %v2663_v62  ;;  %1892 = vst.msk [vmem:[%s4860_s16] sm:$0x3] %vm1875_vm5, %v2663_v62 }
 0x784   :  { %v1857_v60 = vmul.f32 6.0, %v1856_v50 }
 0x786   :  { %v1858_v0 = vadd.f32 -10.0, %v1857_v60 }
 0x788   :  { %v1859_v1 = vmul.f32 1.442695, %v1858_v0 }
 0x78a   :  { %2664 = vpow2.f32 %v1859_v1 }
 0x794   :  { %v2665_v63 = vpop.eup %2664 }
 0x795   :  { %1863 = vrot.lane.b32.xlu1 %v2665_v63, %s2674_s18 }
 0x799   :  { %1871 = vrot.lane.b32.xlu1 %v1858_v0, %s2674_s18 }
 0x807   :  { %v1864_v4 = vpop.permute.xlu1 %1863 }
 0x808   :  { %v1866_v5 = vmul.f32 %v1864_v4, %v1861_v2 }
 0x80a   :  { %v1867_v7 = vadd.f32 %v1866_v5, %v1852_v59 }
 0x80b   :  { %v1872_v37 = vpop.permute.xlu1 %1871 }
 0x80c   :  { %2666 = vtanh.f32 %v1867_v7  ;;  %v1874_v8 = vsub.f32 %v1869_v6, %v1872_v37 }
 0x80e   :  { %v1876_v9 = vsel %vm1875_vm5, %v1874_v8, 0.0 }
 0x80f   :  { %1877 = vadd.xlane.f32.xlu0 %v1876_v9 }
 0x816   :  { %v2667_v10 = vpop.eup %2666 }
 0x817   :  { %v1881_v53 = vmul.f32 %v2667_v10, %v2667_v10 }
 0x819   :  { %v1882_v12 = vsub.f32 1.0, %v1881_v53 }
 0x81b   :  { %v1883_v61 = vmax.f32 %v1882_v12, 0.0 }
 0x81d   :  { %v1884_v55 = vadd.f32 1e-06, %v1883_v61 }
 0x81f   :  { %2668 = vlog2.f32 %v1884_v55 }
 0x825   :  { %1894 = vrot.lane.b32.xlu0 %v2667_v10, %s2675_s19 }
 0x829   :  { %v2669_v13 = vpop.eup %2668  ;;  %1899 = vrot.lane.b32.xlu0 %v1858_v0, %s2675_s19 }
 0x82a   :  { %v1886_v14 = vmul.f32 0.6931472, %v2669_v13 }
 0x82c   :  { %v1887_v15 = vsel %vm1875_vm5, %v1886_v14, 0.0 }
 0x82d   :  { %1888 = vadd.xlane.f32.xlu1 %v1887_v15 }
 0x89c   :  { %v1878_v17 = vpop.xlane.xlu0 %1877 }
 0x89d   :  { %v1921_v20 = vadd.f32 -3.675754, %v1878_v17 }
 0x8a0   :  { %v1895_v18 = vpop.permute.xlu0 %1894 }
 0x8a1   :  { %1898 = vst.msk [vmem:[%s4860_s16] sm:$0x3] %vm1897_vm6, %v1895_v18 }
 0x8a4   :  { %v1900_v19 = vpop.permute.xlu0 %1899 }
 0x8a5   :  { %1903 = vst.msk [vmem:[%s4860_s16] sm:$0x3] %vm1902_vm7, %v1900_v19 }
 0x8ba   :  { %v1889_v21 = vpop.xlane.xlu1 %1888 }
 0x8bb   :  { %v1890_v23 = vsub.f32 %v1921_v20, %v1889_v21 }
 0x8bd   :  { %1905 = vst.msk [vmem:[%s4860_s16] sm:$0x3] %vm1904_vm8, %v1890_v23 }

</bundles_post_ra>
